<compile_context>
chip_gen: v7x
topology: tpu7x:2x2x1
jax: 0.10.0
libtpu: 0.0.40
codegen_flags: <defaults>
</compile_context>

<pallas_src>
import functools

import jax
import jax.numpy as jnp
from jax import lax
from jax.experimental import pallas as pl
from jax.experimental.pallas import tpu as pltpu


def dcn_kernel(idx_ref, tabT_ref, dwT_ref, db_ref, cw_ref, fcw_ref, fcb_ref, out_ref):
    """One batch tile of the Deep & Cross forward, batch on the lane axis.

    idx_ref : (F, TB)     int32  per-field embedding indices (batch on lanes)
    tabT_ref: (E, V)      bf16   transposed embedding table
    dwT_ref : (L, D, D)   bf16   deep Linear weights, pre-transposed: y^T = W^T @ x^T
    db_ref  : (L, D, 1)   f32    deep Linear biases (column vectors)
    cw_ref  : (L, D, 1)   f32    cross-layer weight vectors (column vectors)
    fcw_ref : (3, D, 1)   f32    final fc weight segments [emb | deep | cross]
    fcb_ref : (1,)        f32    final fc bias (SMEM scalar)
    out_ref : (1, TB)     f32    sigmoid(logit), batch on lanes (lane-dense store)
    """
    F, TB = idx_ref.shape
    V = tabT_ref.shape[1]
    L = dwT_ref.shape[0]
    cdt = tabT_ref.dtype                      # bf16 MXU operand dtype

    idx = idx_ref[...]                        # (F, TB) int32
    tabT = tabT_ref[...]                      # (E, V)  bf16

    # ---- fused embedding gather: table^T @ onehot^T per field (MXU, exact) ----
    row = lax.broadcasted_iota(jnp.int32, (V, TB), 0)          # (V, TB): value = vocab row
    segs = []
    for f in range(F):                        # static unroll, F is small
        onehot_t = (row == idx[f:f + 1, :]).astype(cdt)        # (V, TB)
        segs.append(jnp.dot(tabT, onehot_t,
                            preferred_element_type=jnp.float32))  # (E, TB)
    emb_t = jnp.concatenate(segs, axis=0)     # (D, TB) f32, D = F * E

    # ---- deep & cross towers (transposed) ----
    deep_t = emb_t
    cross_t = emb_t
    for i in range(L):                        # static unroll (small L)
        # Deep: Linear -> ReLU -> Dropout(eval = identity); bf16 MXU operands, f32 acc.
        deep_t = jnp.dot(dwT_ref[i], deep_t.astype(cdt),
                         preferred_element_type=jnp.float32) + db_ref[i]
        deep_t = jnp.maximum(deep_t, 0.0)
        # Cross: cross <- (cross . w_i) * cross + x0   (f32 VPU + XLU reduce)
        s = jnp.sum(cross_t * cw_ref[i], axis=0, keepdims=True)   # (1, TB)
        cross_t = s * cross_t + emb_t

    # ---- final fc + sigmoid: VPU multiply + one sublane reduce, lane-dense store ----
    weighted = (fcw_ref[0] * emb_t + fcw_ref[1] * deep_t + fcw_ref[2] * cross_t)
    logit_t = jnp.sum(weighted, axis=0, keepdims=True) + fcb_ref[0]   # (1, TB)
    out_ref[...] = jax.nn.sigmoid(logit_t).astype(out_ref.dtype)


def prepare_params(emb_table, dw, db, cw, fc_w, fc_b, num_fields,
                   compute_dtype=jnp.bfloat16):
    """One-time parameter packing (layout + dtype) for the kernel."""
    V, E = emb_table.shape
    L, _, D = dw.shape
    F = num_fields
    assert F * E == D, "module implicitly requires num_fields * embed_dim == sum(field_dims)"

    tabT = jnp.transpose(emb_table).astype(compute_dtype)          # (E, V)
    dwT = jnp.transpose(dw, (0, 2, 1)).astype(compute_dtype)       # (L, D, D): y^T = W^T x^T
    db_c = db.astype(jnp.float32)[:, :, None]                      # (L, D, 1) column vectors
    cw_c = cw.astype(jnp.float32)[:, :, None]                      # (L, D, 1)
    fcw_c = fc_w.astype(jnp.float32)[:, :, None]                   # (3, D, 1)
    fcb = fc_b.reshape(-1).astype(jnp.float32)                     # (1,) scalar for SMEM
    return tabT, dwT, db_c, cw_c, fcw_c, fcb


@functools.partial(jax.jit, static_argnames=("batch_tile",))
def deep_and_cross_forward(x_idx, tabT, dwT, db_c, cw_c, fcw_c, fcb, *, batch_tile=256):
    B, F = x_idx.shape
    E, V = tabT.shape
    L, D, _ = dwT.shape

    num_tiles = pl.cdiv(B, batch_tile)
    Bp = num_tiles * batch_tile
    if Bp != B:                               # pad remainder rows (index 0), sliced off below
        x_idx = jnp.pad(x_idx, ((0, Bp - B), (0, 0)))

    idx_t = jnp.transpose(x_idx, (1, 0))      # (F, Bp) int32, batch on the lane axis

    out = pl.pallas_call(
        dcn_kernel,
        out_shape=jax.ShapeDtypeStruct((1, Bp), jnp.float32),
        grid=(num_tiles,),
        in_specs=[
            pl.BlockSpec((F, batch_tile), lambda b: (0, b)),      # lane-dense indices
            pl.BlockSpec((E, V), lambda b: (0, 0)),               # params fully VMEM-resident
            pl.BlockSpec((L, D, D), lambda b: (0, 0, 0)),
            pl.BlockSpec((L, D, 1), lambda b: (0, 0, 0)),
            pl.BlockSpec((L, D, 1), lambda b: (0, 0, 0)),
            pl.BlockSpec((3, D, 1), lambda b: (0, 0, 0)),
            pl.BlockSpec(memory_space=pltpu.MemorySpace.SMEM),    # fc bias scalar in SMEM
        ],
        out_specs=pl.BlockSpec((1, batch_tile), lambda b: (0, b)),  # lane-dense output
        compiler_params=pltpu.CompilerParams(
            dimension_semantics=("parallel",)),
    )(idx_t, tabT, dwT, db_c, cw_c, fcw_c, fcb)

    return out[0, :B]                          # torch .squeeze() -> (B,)


def reference_forward(x_idx, emb_table, dw, db, cw, fcw, fcb, compute_dtype=jnp.bfloat16):
    """Pure-JAX reference mirroring the kernel's precision choices."""
    B, F = x_idx.shape
    V, E = emb_table.shape
    tab = emb_table.astype(compute_dtype).astype(jnp.float32)
    emb = tab[x_idx].reshape(B, F * E)
    deep = emb
    cross = emb
    for i in range(dw.shape[0]):
        deep = jnp.dot(deep.astype(compute_dtype), dw[i].astype(compute_dtype),
                       preferred_element_type=jnp.float32) + db[i]
        deep = jnp.maximum(deep, 0.0)
        s = jnp.sum(cross * cw[i], axis=-1, keepdims=True)
        cross = s * cross + emb

    logit = (jnp.sum(fcw[0] * emb, axis=-1)
             + jnp.sum(fcw[1] * deep, axis=-1)
             + jnp.sum(fcw[2] * cross, axis=-1)
             + fcb[0])
    return jax.nn.sigmoid(logit)


if __name__ == "__main__":
    # Module hyper-parameters (chosen so num_fields * embed_dim == sum(field_dims),
    # which the original module implicitly requires).
    field_dims = [32, 32, 32, 32]             # sum = 128  (also the vocab size V)
    embed_dim = 32
    num_layers = 2
    dropout = 0.5                             # eval mode -> identity
    D = sum(field_dims)                       # 128
    V = sum(field_dims)                       # embedding vocab = sum(field_dims)
    F = len(field_dims)                       # 4
    B = 500                                   # deliberately NOT a multiple of the batch tile
    batch_tile = 256                          # 2 grid steps -> both TCs on v7x

    key = jax.random.PRNGKey(0)
    k_tab, k_dw, k_db, k_cw, k_fcw, k_x = jax.random.split(key, 6)

    emb_table = jax.random.normal(k_tab, (V, embed_dim), jnp.float32) * 0.1
    dw = jax.random.normal(k_dw, (num_layers, D, D), jnp.float32) / jnp.sqrt(D)
    db = jax.random.normal(k_db, (num_layers, D), jnp.float32) * 0.01
    cw = jax.random.normal(k_cw, (num_layers, D), jnp.float32) / jnp.sqrt(D)
    fcw = jax.random.normal(k_fcw, (3, D), jnp.float32) * 0.05
    fcb = jnp.zeros((1,), jnp.float32)

    x = jax.random.randint(k_x, (B, F), 0, V, dtype=jnp.int32)        # feature indices

    params = prepare_params(emb_table, dw, db, cw, fcw, fcb, F)
    out = deep_and_cross_forward(x, *params, batch_tile=batch_tile)
    out = jax.block_until_ready(out)

    ref = reference_forward(x, emb_table, dw, db, cw, fcw, fcb)
    assert out.shape == (B,)
    assert jnp.allclose(out, ref, rtol=1e-3, atol=1e-3), float(jnp.max(jnp.abs(out - ref)))

    print("KERNEL_OK")
</pallas_src>

<mosaic_0001>
module attributes {stable_mosaic.version = 11 : i64} {
  func.func @dcn_kernel(%arg0: i32, %arg1: memref<4x256xi32, #tpu.memory_space<vmem>>, %arg2: memref<32x128xbf16, #tpu.memory_space<vmem>>, %arg3: memref<2x128x128xbf16, #tpu.memory_space<vmem>>, %arg4: memref<2x128x1xf32, #tpu.memory_space<vmem>>, %arg5: memref<2x128x1xf32, #tpu.memory_space<vmem>>, %arg6: memref<3x128x1xf32, #tpu.memory_space<vmem>>, %arg7: memref<1xf32, #tpu.memory_space<smem>>, %arg8: memref<1x256xf32, #tpu.memory_space<vmem>>) attributes {dimension_semantics = [#tpu.dimension_semantics<parallel>], iteration_bounds = array<i64: 2>, scalar_prefetch = 0 : i64, scratch_operands = 0 : i64, tpu.core_type = #tpu.core_type<tc>, window_params = [{transform_indices = @transform_0, window_bounds = array<i64: 4, 256>}, {pipeline_mode = #tpu.pipeline_mode<synchronous>, transform_indices = @transform_1, window_bounds = array<i64: 32, 128>}, {pipeline_mode = #tpu.pipeline_mode<synchronous>, transform_indices = @transform_2, window_bounds = array<i64: 2, 128, 128>}, {pipeline_mode = #tpu.pipeline_mode<synchronous>, transform_indices = @transform_3, window_bounds = array<i64: 2, 128, 1>}, {pipeline_mode = #tpu.pipeline_mode<synchronous>, transform_indices = @transform_4, window_bounds = array<i64: 2, 128, 1>}, {pipeline_mode = #tpu.pipeline_mode<synchronous>, transform_indices = @transform_5, window_bounds = array<i64: 3, 128, 1>}, {transform_indices = @transform_6, window_bounds = array<i64: 1>}, {transform_indices = @transform_7, window_bounds = array<i64: 1, 256>}]} {
    %c0 = arith.constant 0 : index
    %c0_0 = arith.constant 0 : index
    %0 = vector.load %arg1[%c0, %c0_0] : memref<4x256xi32, #tpu.memory_space<vmem>>, vector<4x256xi32>
    %c0_1 = arith.constant 0 : index
    %c0_2 = arith.constant 0 : index
    %1 = vector.load %arg2[%c0_1, %c0_2] : memref<32x128xbf16, #tpu.memory_space<vmem>>, vector<32x128xbf16>
    %2 = tpu.iota {dimensions = array<i32: 0>} : vector<128x256xi32>
    %3 = vector.extract_strided_slice %0 {offsets = [0, 0], sizes = [1, 256], strides = [1, 1]} : vector<4x256xi32> to vector<1x256xi32>
    %4 = vector.broadcast %3 : vector<1x256xi32> to vector<128x256xi32>
    %5 = arith.cmpi eq, %2, %4 : vector<128x256xi32>
    %6 = arith.extui %5 : vector<128x256xi1> to vector<128x256xi32>
    %7 = arith.sitofp %6 : vector<128x256xi32> to vector<128x256xf32>
    %8 = arith.truncf %7 : vector<128x256xf32> to vector<128x256xbf16>
    %cst = arith.constant dense<0.000000e+00> : vector<32x256xf32>
    %9 = tpu.matmul %1, %8, %cst {dimension_numbers = #tpu.dot_dimension_numbers<[1], [0], [0], [1], [0, 0, 1, 1], [], []>} : vector<32x128xbf16>, vector<128x256xbf16>, vector<32x256xf32> -> vector<32x256xf32>
    %10 = vector.extract_strided_slice %0 {offsets = [1, 0], sizes = [1, 256], strides = [1, 1]} : vector<4x256xi32> to vector<1x256xi32>
    %11 = vector.broadcast %10 : vector<1x256xi32> to vector<128x256xi32>
    %12 = arith.cmpi eq, %2, %11 : vector<128x256xi32>
    %13 = arith.extui %12 : vector<128x256xi1> to vector<128x256xi32>
    %14 = arith.sitofp %13 : vector<128x256xi32> to vector<128x256xf32>
    %15 = arith.truncf %14 : vector<128x256xf32> to vector<128x256xbf16>
    %cst_3 = arith.constant dense<0.000000e+00> : vector<32x256xf32>
    %16 = tpu.matmul %1, %15, %cst_3 {dimension_numbers = #tpu.dot_dimension_numbers<[1], [0], [0], [1], [0, 0, 1, 1], [], []>} : vector<32x128xbf16>, vector<128x256xbf16>, vector<32x256xf32> -> vector<32x256xf32>
    %17 = vector.extract_strided_slice %0 {offsets = [2, 0], sizes = [1, 256], strides = [1, 1]} : vector<4x256xi32> to vector<1x256xi32>
    %18 = vector.broadcast %17 : vector<1x256xi32> to vector<128x256xi32>
    %19 = arith.cmpi eq, %2, %18 : vector<128x256xi32>
    %20 = arith.extui %19 : vector<128x256xi1> to vector<128x256xi32>
    %21 = arith.sitofp %20 : vector<128x256xi32> to vector<128x256xf32>
    %22 = arith.truncf %21 : vector<128x256xf32> to vector<128x256xbf16>
    %cst_4 = arith.constant dense<0.000000e+00> : vector<32x256xf32>
    %23 = tpu.matmul %1, %22, %cst_4 {dimension_numbers = #tpu.dot_dimension_numbers<[1], [0], [0], [1], [0, 0, 1, 1], [], []>} : vector<32x128xbf16>, vector<128x256xbf16>, vector<32x256xf32> -> vector<32x256xf32>
    %24 = vector.extract_strided_slice %0 {offsets = [3, 0], sizes = [1, 256], strides = [1, 1]} : vector<4x256xi32> to vector<1x256xi32>
    %25 = vector.broadcast %24 : vector<1x256xi32> to vector<128x256xi32>
    %26 = arith.cmpi eq, %2, %25 : vector<128x256xi32>
    %27 = arith.extui %26 : vector<128x256xi1> to vector<128x256xi32>
    %28 = arith.sitofp %27 : vector<128x256xi32> to vector<128x256xf32>
    %29 = arith.truncf %28 : vector<128x256xf32> to vector<128x256xbf16>
    %cst_5 = arith.constant dense<0.000000e+00> : vector<32x256xf32>
    %30 = tpu.matmul %1, %29, %cst_5 {dimension_numbers = #tpu.dot_dimension_numbers<[1], [0], [0], [1], [0, 0, 1, 1], [], []>} : vector<32x128xbf16>, vector<128x256xbf16>, vector<32x256xf32> -> vector<32x256xf32>
    %31 = tpu.concatenate %9, %16, %23, %30 in 0 : vector<32x256xf32>, vector<32x256xf32>, vector<32x256xf32>, vector<32x256xf32> -> vector<128x256xf32>
    %c0_6 = arith.constant 0 : index
    %c0_7 = arith.constant 0 : index
    %c0_8 = arith.constant 0 : index
    %32 = vector.load %arg3[%c0_6, %c0_7, %c0_8] : memref<2x128x128xbf16, #tpu.memory_space<vmem>>, vector<1x128x128xbf16>
    %33 = vector.shape_cast %32 : vector<1x128x128xbf16> to vector<128x128xbf16>
    %34 = arith.truncf %31 : vector<128x256xf32> to vector<128x256xbf16>
    %cst_9 = arith.constant dense<0.000000e+00> : vector<128x256xf32>
    %35 = tpu.matmul %33, %34, %cst_9 {dimension_numbers = #tpu.dot_dimension_numbers<[1], [0], [0], [1], [0, 0, 1, 1], [], []>} : vector<128x128xbf16>, vector<128x256xbf16>, vector<128x256xf32> -> vector<128x256xf32>
    %c0_10 = arith.constant 0 : index
    %c0_11 = arith.constant 0 : index
    %c0_12 = arith.constant 0 : index
    %36 = vector.load %arg4[%c0_10, %c0_11, %c0_12] : memref<2x128x1xf32, #tpu.memory_space<vmem>>, vector<1x128x1xf32>
    %37 = vector.shape_cast %36 : vector<1x128x1xf32> to vector<128x1xf32>
    %38 = vector.broadcast %37 : vector<128x1xf32> to vector<128x256xf32>
    %39 = arith.addf %35, %38 : vector<128x256xf32>
    %cst_13 = arith.constant 0.000000e+00 : f32
    %40 = vector.broadcast %cst_13 : f32 to vector<128x256xf32>
    %41 = arith.maximumf %39, %40 : vector<128x256xf32>
    %c0_14 = arith.constant 0 : index
    %c0_15 = arith.constant 0 : index
    %c0_16 = arith.constant 0 : index
    %42 = vector.load %arg5[%c0_14, %c0_15, %c0_16] : memref<2x128x1xf32, #tpu.memory_space<vmem>>, vector<1x128x1xf32>
    %43 = vector.shape_cast %42 : vector<1x128x1xf32> to vector<128x1xf32>
    %44 = vector.broadcast %43 : vector<128x1xf32> to vector<128x256xf32>
    %45 = arith.mulf %31, %44 : vector<128x256xf32>
    %cst_17 = arith.constant dense<0.000000e+00> : vector<256xf32>
    %46 = vector.multi_reduction <add>, %45, %cst_17 [0] : vector<128x256xf32> to vector<256xf32>
    %47 = vector.shape_cast %46 : vector<256xf32> to vector<1x256xf32>
    %48 = vector.broadcast %47 : vector<1x256xf32> to vector<128x256xf32>
    %49 = arith.mulf %48, %31 : vector<128x256xf32>
    %50 = arith.addf %49, %31 : vector<128x256xf32>
    %c1 = arith.constant 1 : index
    %c0_18 = arith.constant 0 : index
    %c0_19 = arith.constant 0 : index
    %51 = vector.load %arg3[%c1, %c0_18, %c0_19] : memref<2x128x128xbf16, #tpu.memory_space<vmem>>, vector<1x128x128xbf16>
    %52 = vector.shape_cast %51 : vector<1x128x128xbf16> to vector<128x128xbf16>
    %53 = arith.truncf %41 : vector<128x256xf32> to vector<128x256xbf16>
    %cst_20 = arith.constant dense<0.000000e+00> : vector<128x256xf32>
    %54 = tpu.matmul %52, %53, %cst_20 {dimension_numbers = #tpu.dot_dimension_numbers<[1], [0], [0], [1], [0, 0, 1, 1], [], []>} : vector<128x128xbf16>, vector<128x256xbf16>, vector<128x256xf32> -> vector<128x256xf32>
    %c1_21 = arith.constant 1 : index
    %c0_22 = arith.constant 0 : index
    %c0_23 = arith.constant 0 : index
    %55 = vector.load %arg4[%c1_21, %c0_22, %c0_23] : memref<2x128x1xf32, #tpu.memory_space<vmem>>, vector<1x128x1xf32>
    %56 = vector.shape_cast %55 : vector<1x128x1xf32> to vector<128x1xf32>
    %57 = vector.broadcast %56 : vector<128x1xf32> to vector<128x256xf32>
    %58 = arith.addf %54, %57 : vector<128x256xf32>
    %cst_24 = arith.constant 0.000000e+00 : f32
    %59 = vector.broadcast %cst_24 : f32 to vector<128x256xf32>
    %60 = arith.maximumf %58, %59 : vector<128x256xf32>
    %c1_25 = arith.constant 1 : index
    %c0_26 = arith.constant 0 : index
    %c0_27 = arith.constant 0 : index
    %61 = vector.load %arg5[%c1_25, %c0_26, %c0_27] : memref<2x128x1xf32, #tpu.memory_space<vmem>>, vector<1x128x1xf32>
    %62 = vector.shape_cast %61 : vector<1x128x1xf32> to vector<128x1xf32>
    %63 = vector.broadcast %62 : vector<128x1xf32> to vector<128x256xf32>
    %64 = arith.mulf %50, %63 : vector<128x256xf32>
    %cst_28 = arith.constant dense<0.000000e+00> : vector<256xf32>
    %65 = vector.multi_reduction <add>, %64, %cst_28 [0] : vector<128x256xf32> to vector<256xf32>
    %66 = vector.shape_cast %65 : vector<256xf32> to vector<1x256xf32>
    %67 = vector.broadcast %66 : vector<1x256xf32> to vector<128x256xf32>
    %68 = arith.mulf %67, %50 : vector<128x256xf32>
    %69 = arith.addf %68, %31 : vector<128x256xf32>
    %c0_29 = arith.constant 0 : index
    %c0_30 = arith.constant 0 : index
    %c0_31 = arith.constant 0 : index
    %70 = vector.load %arg6[%c0_29, %c0_30, %c0_31] : memref<3x128x1xf32, #tpu.memory_space<vmem>>, vector<1x128x1xf32>
    %71 = vector.shape_cast %70 : vector<1x128x1xf32> to vector<128x1xf32>
    %72 = vector.broadcast %71 : vector<128x1xf32> to vector<128x256xf32>
    %73 = arith.mulf %72, %31 : vector<128x256xf32>
    %c1_32 = arith.constant 1 : index
    %c0_33 = arith.constant 0 : index
    %c0_34 = arith.constant 0 : index
    %74 = vector.load %arg6[%c1_32, %c0_33, %c0_34] : memref<3x128x1xf32, #tpu.memory_space<vmem>>, vector<1x128x1xf32>
    %75 = vector.shape_cast %74 : vector<1x128x1xf32> to vector<128x1xf32>
    %76 = vector.broadcast %75 : vector<128x1xf32> to vector<128x256xf32>
    %77 = arith.mulf %76, %60 : vector<128x256xf32>
    %78 = arith.addf %73, %77 : vector<128x256xf32>
    %c2 = arith.constant 2 : index
    %c0_35 = arith.constant 0 : index
    %c0_36 = arith.constant 0 : index
    %79 = vector.load %arg6[%c2, %c0_35, %c0_36] : memref<3x128x1xf32, #tpu.memory_space<vmem>>, vector<1x128x1xf32>
    %80 = vector.shape_cast %79 : vector<1x128x1xf32> to vector<128x1xf32>
    %81 = vector.broadcast %80 : vector<128x1xf32> to vector<128x256xf32>
    %82 = arith.mulf %81, %69 : vector<128x256xf32>
    %83 = arith.addf %78, %82 : vector<128x256xf32>
    %cst_37 = arith.constant dense<0.000000e+00> : vector<256xf32>
    %84 = vector.multi_reduction <add>, %83, %cst_37 [0] : vector<128x256xf32> to vector<256xf32>
    %85 = vector.shape_cast %84 : vector<256xf32> to vector<1x256xf32>
    %c0_38 = arith.constant 0 : index
    %86 = memref.load %arg7[%c0_38] : memref<1xf32, #tpu.memory_space<smem>>
    %87 = vector.broadcast %86 : f32 to vector<1x256xf32>
    %88 = arith.addf %85, %87 : vector<1x256xf32>
    %89 = arith.negf %88 : vector<1x256xf32>
    %90 = math.exp %89 : vector<1x256xf32>
    %cst_39 = arith.constant 1.000000e+00 : f32
    %91 = vector.broadcast %cst_39 : f32 to vector<1x256xf32>
    %92 = arith.addf %91, %90 : vector<1x256xf32>
    %93 = arith.divf %91, %92 : vector<1x256xf32>
    %c0_40 = arith.constant 0 : index
    %c0_41 = arith.constant 0 : index
    %94 = vector.load %arg8[%c0_40, %c0_41] : memref<1x256xf32, #tpu.memory_space<vmem>>, vector<1x256xf32>
    tpu.vector_store %arg8[%c0_40, %c0_41], %93 {strides = array<i32>} : memref<1x256xf32, #tpu.memory_space<vmem>>, vector<1x256xf32>,
    return
  }
  func.func @transform_0(%arg0: i32) -> (i32, i32) {
    %c0_i32 = arith.constant 0 : i32
    %c0_i32_0 = arith.constant 0 : i32
    return %c0_i32, %arg0 : i32, i32
  }
  func.func @transform_1(%arg0: i32) -> (i32, i32) {
    %c0_i32 = arith.constant 0 : i32
    %c0_i32_0 = arith.constant 0 : i32
    %c0_i32_1 = arith.constant 0 : i32
    return %c0_i32, %c0_i32_0 : i32, i32
  }
  func.func @transform_2(%arg0: i32) -> (i32, i32, i32) {
    %c0_i32 = arith.constant 0 : i32
    %c0_i32_0 = arith.constant 0 : i32
    %c0_i32_1 = arith.constant 0 : i32
    %c0_i32_2 = arith.constant 0 : i32
    return %c0_i32, %c0_i32_0, %c0_i32_1 : i32, i32, i32
  }
  func.func @transform_3(%arg0: i32) -> (i32, i32, i32) {
    %c0_i32 = arith.constant 0 : i32
    %c0_i32_0 = arith.constant 0 : i32
    %c0_i32_1 = arith.constant 0 : i32
    %c0_i32_2 = arith.constant 0 : i32
    return %c0_i32, %c0_i32_0, %c0_i32_1 : i32, i32, i32
  }
  func.func @transform_4(%arg0: i32) -> (i32, i32, i32) {
    %c0_i32 = arith.constant 0 : i32
    %c0_i32_0 = arith.constant 0 : i32
    %c0_i32_1 = arith.constant 0 : i32
    %c0_i32_2 = arith.constant 0 : i32
    return %c0_i32, %c0_i32_0, %c0_i32_1 : i32, i32, i32
  }
  func.func @transform_5(%arg0: i32) -> (i32, i32, i32) {
    %c0_i32 = arith.constant 0 : i32
    %c0_i32_0 = arith.constant 0 : i32
    %c0_i32_1 = arith.constant 0 : i32
    %c0_i32_2 = arith.constant 0 : i32
    return %c0_i32, %c0_i32_0, %c0_i32_1 : i32, i32, i32
  }
  func.func @transform_6(%arg0: i32) -> i32 {
    %c0_i32 = arith.constant 0 : i32
    %c0_i32_0 = arith.constant 0 : i32
    return %c0_i32 : i32
  }
  func.func @transform_7(%arg0: i32) -> (i32, i32) {
    %c0_i32 = arith.constant 0 : i32
    %c0_i32_0 = arith.constant 0 : i32
    return %c0_i32, %arg0 : i32, i32
  }
}

</mosaic_0001>

<bundles_post_ra>
// kernel: deep_and_cross_forward.1
= control target key start
LH: loop header
LB: loop body
LE: loop exit
PB: predicated region body
PF: predicated region fallthrough
CT: control target
= control target key end

     0   :  { %s5396_s0 = inlined_call_operand.vmem [shape: s32[4,512], index: 0, kind: input, shape index: {}]   ;;  %s5397_s1 = inlined_call_operand.vmem [shape: bf16[32,128], index: 1, kind: input, shape index: {}]   ;;  %s5398_s2 = inlined_call_operand.vmem [shape: bf16[2,128,128], index: 2, kind: input, shape index: {}]   ;;  %s5399_s3 = inlined_call_operand.vmem [shape: f32[2,128,1], index: 3, kind: input, shape index: {}]   ;;  %s5400_s4 = inlined_call_operand.vmem [shape: f32[2,128,1], index: 4, kind: input, shape index: {}]   ;;  %s5401_s5 = inlined_call_operand.vmem [shape: f32[3,128,1], index: 5, kind: input, shape index: {}]   ;;  %s5402_s6 = inlined_call_operand.<no memory space> [shape: f32[1], index: 6, kind: input, shape index: {}]   ;;  %s5403_s7 = inlined_call_operand.hbm [shape: f32[1,512], index: 7, kind: output, shape index: {}]  }
   0x1   :  { %12 = sst [smem:[#allocation2]] %s5402_s6 }
   0x2   :  { %13 = vsyncpa [#allocation4], 0 }
   0x3   :  { %15 = vsyncpa [#allocation4 + $0x1], 0  ;;  %s3308_s26 = smov 0   ;;  %s3310_s27 = smov 0  }
   0x4   :  { %s3312_s28 = smov 0   ;;  %s3314_s29 = smov 0  }
   0x5 LB: > { %s3329_s6 = sadd.s32 4294967295, %s3259_s29   ;;  %s2758_s30 = sadd.s32 4294967294, %s3259_s29   ;;  %s3259_s29 = sphi %s3314_s29, %s5738_s29   ;;  %s3255_s28 = sphi %s3312_s28, %s5737_s28   ;;  %s3251_s27 = sphi %s3310_s27, %s5736_s27   ;;  %s3247_s26 = sphi %s3308_s26, %s5735_s26  }
   0x6   : > { %s3333_s8 = sadd.s32 1, %s3259_s29   ;;  %s180_s9 = sadd.s32 1, %s3255_s28 }
   0x7   : > { %s177_s10 = ssub.s32 %s3259_s29, %s3333_s8  ;;  %p190_p0 = scmp.ne.s32.totalorder %s3255_s28, %s3251_s27 }
   0x8   : > { %p178_p1 = scmp.eq.s32.totalorder %s177_s10, 0  ;;  %p191_p2 = scmp.eq.s32.totalorder %s3329_s6, 1 }
   0x9   : > { %p196_p3 = scmp.ne.s32.totalorder %s3251_s27, %s3247_s26  ;;  %p197_p4 = scmp.eq.s32.totalorder %s2758_s30, 1 }
   0xa   : > { %s3344_s11 = scalar_select %p178_p1, %s3255_s28, %s180_s9  }
   0xb   : > { %p3346_p5 = por %p191_p2, %p190_p0  ;;  %p3350_p6 = por %p197_p4, %p196_p3 }
   0xc   : > { %p2761_p7 = scmp.ge.s32.totalorder %s3259_s29, 1  ;;  %p242_p8 = scmp.lt.s32.totalorder %s3259_s29, 3 }
   0xe   : > { %p243_p9 = pnand %p2761_p7, %p242_p8 }
  0x10   : > { %246 = sbr.rel (%p243_p9) target bundleno = 963 (0x3c3), region = 48 }
  0x17   : > { %v1074_v0 = vld [vmem:[%s5399_s3 + $0x10] sm:$0xff]  ;;  %v1072_v1 = vld [vmem:[%s5399_s3] sm:$0xff]  ;;  %s2763_s18 = sshll.u32 %s3329_s6, 1  ;;  %v5404_v2 = vlaneseq  ;;  %v5405_v3 = vmov 0   ;;  %v1075_v5 = vld [vmem:[%s5399_s3 + $0x18] sm:$0xff]  ;;  %s2645_s24 = sld [smem:[#allocation2]] }
  0x18   : > { %3170 = vset.pattern.permute.xlu1 %v5405_v3  ;;  %3169 = vset.pattern.permute.xlu0 %v5405_v3  ;;  %p275_p10 = scmp.lt.s32.totalorder %s2763_s18, 3  ;;  %v1073_v6 = vld [vmem:[%s5399_s3 + $0x8] sm:$0xff]  ;;  %v1076_v12 = vld [vmem:[%s5399_s3 + $0x20] sm:$0xff]  ;;  %v1079_v24 = vld [vmem:[%s5399_s3 + $0x38] sm:$0xff]  ;;  %v3262_v29 = vmov 1.0|1.0  }
  0x19   : > { %1100 = vperm.xlu1 %3170, %v1074_v0   ;;  %1090 = vperm.xlu0 %3169, %v1072_v1   ;;  %v3366_v4 = vshrl.u32 %v5404_v2, 7  ;;  %v1077_v11 = vld [vmem:[%s5399_s3 + $0x28] sm:$0xff]  ;;  %v1078_v25 = vld [vmem:[%s5399_s3 + $0x30] sm:$0xff]  ;;  %v1080_v31 = vld [vmem:[%s5399_s3 + $0x40] sm:$0xff]  ;;  %s271_s25 = sand.u32 1, %s3251_s27   ;;  %s3126_s9 = sshll.u32 %s3329_s6, 5 }
  0x1a   : > { %s5740_s18 = smov (!%p275_p10, %s2763_s18), 3  ;;  %476 = vmatprep.mubr.bf16.mxu0 %v5405_v3  ;;  %657 = vmatprep.mubr.bf16.mxu1 %v5405_v3  ;;  %v1081_v30 = vld [vmem:[%s5399_s3 + $0x48] sm:$0xff]  ;;  %v1083_v35 = vld [vmem:[%s5399_s3 + $0x58] sm:$0xff]  ;;  %v1082_v36 = vld [vmem:[%s5399_s3 + $0x50] sm:$0xff]  ;;  %s5354_s17 = scalar_lea.hbm %s5403_s7, %s3126_s9 }
  0x1b   : > { %5504 = vst [vmem:[#allocation6_spill] sm:$0xff] %v3366_v4  ;;  %v306_v7 = vsub.s32 0, %v3366_v4  ;;  %v310_v8 = vsub.s32 4, %v3366_v4  ;;  %s2764_s23 = sshll.u32 %s5740_s18, 2  ;;  %v499_v9 = vsub.s32 1, %v3366_v4  ;;  %v503_v10 = vsub.s32 5, %v3366_v4 }
  0x1c   : > { %s278_s30 = scalar_lea.vmem %s5396_s0, %s2764_s23  ;;  %v3392_v14 = vadd.s32 8, %v3366_v4  ;;  %v3399_v19 = vadd.s32 16, %v3366_v4  ;;  %v3402_v20 = vadd.s32 24, %v3366_v4  ;;  %v3419_v27 = vadd.s32 32, %v3366_v4  ;;  %v1085_v40 = vld [vmem:[%s5399_s3 + $0x68] sm:$0xff]  ;;  %v1084_v41 = vld [vmem:[%s5399_s3 + $0x60] sm:$0xff] }
  0x1d   : > { %1105 = vperm.xlu1 %3170, %v1075_v5   ;;  %1095 = vperm.xlu0 %3169, %v1073_v6   ;;  %v3389_v13 = vld [vmem:[%s278_s30] sm:$0xff]  ;;  %v3422_v28 = vadd.s32 40, %v3366_v4  ;;  %v3468_v33 = vadd.s32 48, %v3366_v4  ;;  %v3471_v34 = vadd.s32 56, %v3366_v4  ;;  %v3521_v38 = vadd.s32 64, %v3366_v4  ;;  %v1087_v45 = vld [vmem:[%s5399_s3 + $0x78] sm:$0xff] }
  0x1e   : > { %v311_v15 = vrot.slane %v3389_v13, %v310_v8  ;;  %v307_v16 = vrot.slane %v3389_v13, %v306_v7  ;;  %v504_v17 = vrot.slane %v3389_v13, %v503_v10  ;;  %v500_v18 = vrot.slane %v3389_v13, %v499_v9  ;;  %v1086_v46 = vld [vmem:[%s5399_s3 + $0x70] sm:$0xff]  ;;  %v1362_v52 = vld [vmem:[%s5400_s4 + $0x8] sm:$0xff]  ;;  %v1361_v53 = vld [vmem:[%s5400_s4] sm:$0xff]  ;;  %s2762_s30 = sshll.u32 %s271_s25, 1  ;;  %s2685_s18 = scalar_lea.sflag [#allocation4], %s271_s25 }
  0x1f   : > { %v3524_v39 = vadd.s32 72, %v3366_v4  ;;  %v3577_v43 = vadd.s32 80, %v3366_v4  ;;  %v3580_v44 = vadd.s32 88, %v3366_v4  ;;  %v3618_v47 = vadd.s32 96, %v3366_v4  ;;  %v1364_v60 = vld [vmem:[%s5400_s4 + $0x18] sm:$0xff]  ;;  %v1363_v61 = vld [vmem:[%s5400_s4 + $0x10] sm:$0xff] }
  0x20   : > { %v3404_v21 = vrot.slane %v311_v15, %v306_v7  ;;  %v3406_v22 = vrot.slane %v307_v16, %v306_v7  ;;  %v3408_v23 = vrot.slane %v504_v17, %v499_v9  ;;  %v3416_v26 = vrot.slane %v500_v18, %v499_v9  ;;  %v1366_v6 = vld [vmem:[%s5400_s4 + $0x28] sm:$0xff]  ;;  %v1365_v7 = vld [vmem:[%s5400_s4 + $0x20] sm:$0xff]  ;;  %v1368_v10 = vld [vmem:[%s5400_s4 + $0x38] sm:$0xff]  ;;  %s273_s10 = scalar_lea.vmem [#allocation3], %s2762_s30  ;;  %s3264_s6 = smov [#allocation3]  }
  0x21   : > { %1115 = vperm.xlu1 %3170, %v1077_v11   ;;  %1110 = vperm.xlu0 %3169, %v1076_v12   ;;  %v3639_v49 = vadd.s32 104, %v3366_v4  ;;  %v684_v50 = vsub.s32 6, %v3366_v4  ;;  %v680_v51 = vsub.s32 2, %v3366_v4  ;;  %v3682_v54 = vadd.s32 112, %v3366_v4  ;;  %v1367_v11 = vld [vmem:[%s5400_s4 + $0x30] sm:$0xff]  ;;  %v3853_v12 = vld [vmem:[%s5397_s1] sm:$0xff]  }
  0x22   : > { %vm321_vm0 = vcmp.eq.s32.totalorder %v3366_v4, %v3404_v21  ;;  %vm323_vm1 = vcmp.eq.s32.totalorder %v3392_v14, %v3404_v21  ;;  %vm320_vm2 = vcmp.eq.s32.totalorder %v3366_v4, %v3406_v22  ;;  %vm322_vm3 = vcmp.eq.s32.totalorder %v3392_v14, %v3406_v22  ;;  %v1370_v16 = vld [vmem:[%s5400_s4 + $0x48] sm:$0xff]  ;;  %v1369_v17 = vld [vmem:[%s5400_s4 + $0x40] sm:$0xff]  ;;  %v3050_v32 = vld [vmem:[%s5399_s3 + $0x98] sm:$0xff]  ;;  %s2699_s14 = sshll.u32 %s273_s10, 4  ;;  %s3201_s20 = sshll.u32 %s3264_s6, 4  ;;  %s5356_s14 = int_to_ptr.vmem [resolvable:$true] %s2699_s14  ;;  %s3202_s20 = int_to_ptr.vmem [resolvable:$false] %s3201_s20 }
  0x23   : > { %vm2799_vm4 = vmpackc.low %vm323_vm1, %vm321_vm0  ;;  %vm325_vm5 = vcmp.eq.s32.totalorder %v3399_v19, %v3404_v21  ;;  %vm327_vm6 = vcmp.eq.s32.totalorder %v3402_v20, %v3404_v21  ;;  %vm324_vm7 = vcmp.eq.s32.totalorder %v3399_v19, %v3406_v22  ;;  %vm326_vm8 = vcmp.eq.s32.totalorder %v3402_v20, %v3406_v22  ;;  %v3054_v37 = vld [vmem:[%s5399_s3 + $0xb8] sm:$0xff]  ;;  %v3057_v42 = vld [vmem:[%s5399_s3 + $0xd0] sm:$0xff]  ;;  %s3197_s19 = scalar_lea.vmem %s5356_s14, 32  ;;  %s3203_s21 = scalar_lea.vmem %s3202_s20, 64 }
  0x24   : > { %vm2801_vm9 = vmpackc.low %vm322_vm3, %vm320_vm2  ;;  %vm514_vm10 = vcmp.eq.s32.totalorder %v3366_v4, %v3408_v23  ;;  %vm516_vm11 = vcmp.eq.s32.totalorder %v3392_v14, %v3408_v23  ;;  %2800 = vmatprep.subr.msk.bf16.mxu0 %vm2799_vm4, %v3262_v29  ;;  %vm513_vm13 = vcmp.eq.s32.totalorder %v3366_v4, %v3416_v26  ;;  %vm515_vm14 = vcmp.eq.s32.totalorder %v3392_v14, %v3416_v26  ;;  %v3074_v48 = vld [vmem:[%s5400_s4 + $0x98] sm:$0xff]  ;;  %v3079_v55 = vld [vmem:[%s5400_s4 + $0xc0] sm:$0xff]  ;;  %p3198_p11 = scmp.ne.s32.totalorder %s5356_s14, %s3197_s19  ;;  %p3204_p0 = scmp.lt.s32.totalorder %s5356_s14, %s3202_s20 }
  0x25   : > { %1125 = vperm.xlu1 %3170, %v1079_v24   ;;  %1120 = vperm.xlu0 %3169, %v1078_v25   ;;  %vm2803_vm12 = vmpackc.low %vm327_vm6, %vm325_vm5  ;;  %vm329_vm0 = vcmp.eq.s32.totalorder %v3419_v27, %v3404_v21  ;;  %vm331_vm1 = vcmp.eq.s32.totalorder %v3422_v28, %v3404_v21  ;;  %vm328_vm3 = vcmp.eq.s32.totalorder %v3419_v27, %v3406_v22  ;;  %v3703_v56 = vadd.s32 120, %v3366_v4  ;;  %v1373_v24 = vld [vmem:[%s5400_s4 + $0x60] sm:$0xff]  ;;  %v1376_v25 = vld [vmem:[%s5400_s4 + $0x78] sm:$0xff]  ;;  %p3205_p1 = scmp.lt.s32.totalorder %s3203_s21, %s3197_s19 }
  0x26   : > { %2802 = vmatpush1.bf16.msk.msra.mxu0 %vm2801_vm9, %v3262_v29  ;;  %vm3459_vm15 = vmpackc.low %vm326_vm8, %vm324_vm7  ;;  %vm330_vm4 = vcmp.eq.s32.totalorder %v3422_v28, %v3406_v22  ;;  %vm518_vm6 = vcmp.eq.s32.totalorder %v3399_v19, %v3408_v23  ;;  %vm520_vm7 = vcmp.eq.s32.totalorder %v3402_v20, %v3408_v23  ;;  %vm517_vm9 = vcmp.eq.s32.totalorder %v3399_v19, %v3416_v26  ;;  %v2153_v63 = vld [vmem:[%s5401_s5] sm:$0xff]  ;;  %v2163_v18 = vld [vmem:[%s5401_s5 + $0x50] sm:$0xff]  ;;  %p3199_p12 = pnand %p3198_p11, %p3346_p5 }
  0x27   : > { %2804 = vmatprep.subr.msk.bf16.mxu0 %vm2803_vm12, %v3262_v29  ;;  %vm2863_vm2 = vmpackc.low %vm516_vm11, %vm514_vm10  ;;  %vm519_vm10 = vcmp.eq.s32.totalorder %v3402_v20, %v3416_v26  ;;  %vm333_vm12 = vcmp.eq.s32.totalorder %v3468_v33, %v3404_v21  ;;  %v685_v57 = vrot.slane %v3389_v13, %v684_v50  ;;  %v681_v58 = vrot.slane %v3389_v13, %v680_v51  ;;  %v3076_v50 = vld [vmem:[%s5400_s4 + $0xa8] sm:$0xff]  ;;  %p3206_p2 = por %p3205_p1, %p3204_p0 }
  0x28   : > { %vm2865_vm5 = vmpackc.low %vm515_vm14, %vm513_vm13  ;;  %2864 = vmatprep.subr.msk.bf16.mxu1 %vm2863_vm2, %v3262_v29  ;;  %vm335_vm13 = vcmp.eq.s32.totalorder %v3471_v34, %v3404_v21  ;;  %vm522_vm2 = vcmp.eq.s32.totalorder %v3419_v27, %v3408_v23  ;;  %v865_v59 = vsub.s32 7, %v3366_v4  ;;  %v861_v62 = vsub.s32 3, %v3366_v4  ;;  %p3200_p13 = pneg %p3199_p12 }
  0x29   : > { %1135 = vperm.xlu1 %3170, %v1081_v30   ;;  %1130 = vperm.xlu0 %3169, %v1080_v31   ;;  %vm2807_vm8 = vmpackc.low %vm331_vm1, %vm329_vm0  ;;  %vm334_vm0 = vcmp.eq.s32.totalorder %v3471_v34, %v3406_v22  ;;  %v3765_v0 = vrot.slane %v685_v57, %v680_v51  ;;  %v3788_v1 = vrot.slane %v681_v58, %v680_v51  ;;  %v3047_v30 = vld [vmem:[%s5399_s3 + $0x80] sm:$0xff]  ;;  %v3081_v57 = vld [vmem:[%s5400_s4 + $0xd0] sm:$0xff] }
  0x2a   : > { %2806 = vmatpush1.bf16.msk.msra.mxu0 %vm3459_vm15, %v3262_v29  ;;  %2866 = vmatpush1.bf16.msk.msra.mxu1 %vm2865_vm5, %v3262_v29  ;;  %vm3512_vm11 = vmpackc.low %vm330_vm4, %vm328_vm3  ;;  %vm332_vm15 = vcmp.eq.s32.totalorder %v3468_v33, %v3406_v22  ;;  %vm524_vm3 = vcmp.eq.s32.totalorder %v3422_v28, %v3408_v23  ;;  %vm521_vm5 = vcmp.eq.s32.totalorder %v3419_v27, %v3416_v26  ;;  %v3075_v51 = vld [vmem:[%s5400_s4 + $0xa0] sm:$0xff]  ;;  %v3084_v58 = vld [vmem:[%s5400_s4 + $0xe8] sm:$0xff]  ;;  %p3207_p3 = pnand %p3206_p2, %p3200_p13 }
  0x2b   : > { %2808 = vmatprep.subr.msk.bf16.mxu0 %vm2807_vm8, %v3262_v29  ;;  %vm2867_vm14 = vmpackc.low %vm520_vm7, %vm518_vm6  ;;  %vm523_vm6 = vcmp.eq.s32.totalorder %v3422_v28, %v3416_v26  ;;  %vm337_vm8 = vcmp.eq.s32.totalorder %v3521_v38, %v3404_v21  ;;  %v866_v5 = vrot.slane %v3389_v13, %v865_v59  ;;  %v862_v8 = vrot.slane %v3389_v13, %v861_v62  ;;  %v3083_v59 = vld [vmem:[%s5400_s4 + $0xe0] sm:$0xff] }
  0x2c   : > { %vm2869_vm1 = vmpackc.low %vm519_vm10, %vm517_vm9  ;;  %2868 = vmatprep.subr.msk.bf16.mxu1 %vm2867_vm14, %v3262_v29  ;;  %vm339_vm9 = vcmp.eq.s32.totalorder %v3524_v39, %v3404_v21  ;;  %vm526_vm14 = vcmp.eq.s32.totalorder %v3468_v33, %v3408_v23 }
  0x2d   : > { %1145 = vperm.xlu1 %3170, %v1083_v35   ;;  %1140 = vperm.xlu0 %3169, %v1082_v36   ;;  %vm2811_vm4 = vmpackc.low %vm335_vm13, %vm333_vm12  ;;  %vm338_vm12 = vcmp.eq.s32.totalorder %v3524_v39, %v3406_v22  ;;  %v3859_v13 = vrot.slane %v866_v5, %v861_v62  ;;  %v3872_v15 = vrot.slane %v862_v8, %v861_v62  ;;  %v3052_v35 = vld [vmem:[%s5399_s3 + $0xa8] sm:$0xff]  ;;  %v3051_v36 = vld [vmem:[%s5399_s3 + $0xa0] sm:$0xff] }
  0x2e   : > { %2810 = vmatpush1.bf16.msk.msra.mxu0 %vm3512_vm11, %v3262_v29  ;;  %2870 = vmatpush1.bf16.msk.msra.mxu1 %vm2869_vm1, %v3262_v29  ;;  %vm3568_vm7 = vmpackc.low %vm334_vm0, %vm332_vm15  ;;  %vm336_vm11 = vcmp.eq.s32.totalorder %v3521_v38, %v3406_v22  ;;  %vm528_vm15 = vcmp.eq.s32.totalorder %v3471_v34, %v3408_v23  ;;  %vm525_vm1 = vcmp.eq.s32.totalorder %v3468_v33, %v3416_v26  ;;  %v2154_v62 = vld [vmem:[%s5401_s5 + $0x8] sm:$0xff]  ;;  %v2155_v5 = vld [vmem:[%s5401_s5 + $0x10] sm:$0xff] }
  0x2f   : > { %2812 = vmatprep.subr.msk.bf16.mxu0 %vm2811_vm4, %v3262_v29  ;;  %vm2871_vm10 = vmpackc.low %vm524_vm3, %vm522_vm2  ;;  %vm527_vm2 = vcmp.eq.s32.totalorder %v3471_v34, %v3416_v26  ;;  %vm341_vm4 = vcmp.eq.s32.totalorder %v3577_v43, %v3404_v21  ;;  %v2157_v8 = vld [vmem:[%s5401_s5 + $0x20] sm:$0xff] }
  0x30   : > { %vm2873_vm13 = vmpackc.low %vm523_vm6, %vm521_vm5  ;;  %2872 = vmatprep.subr.msk.bf16.mxu1 %vm2871_vm10, %v3262_v29  ;;  %vm343_vm5 = vcmp.eq.s32.totalorder %v3580_v44, %v3404_v21  ;;  %vm530_vm10 = vcmp.eq.s32.totalorder %v3521_v38, %v3408_v23 }
  0x31   : > { %1155 = vperm.xlu1 %3170, %v1085_v40   ;;  %1150 = vperm.xlu0 %3169, %v1084_v41   ;;  %vm2815_vm0 = vmpackc.low %vm339_vm9, %vm337_vm8  ;;  %vm342_vm8 = vcmp.eq.s32.totalorder %v3580_v44, %v3406_v22  ;;  %v3055_v40 = vld [vmem:[%s5399_s3 + $0xc0] sm:$0xff]  ;;  %v3058_v41 = vld [vmem:[%s5399_s3 + $0xd8] sm:$0xff] }
  0x32   : > { %2814 = vmatpush1.bf16.msk.msra.mxu0 %vm3568_vm7, %v3262_v29  ;;  %2874 = vmatpush1.bf16.msk.msra.mxu1 %vm2873_vm13, %v3262_v29  ;;  %vm3630_vm3 = vmpackc.low %vm338_vm12, %vm336_vm11  ;;  %vm340_vm7 = vcmp.eq.s32.totalorder %v3577_v43, %v3406_v22  ;;  %vm532_vm11 = vcmp.eq.s32.totalorder %v3524_v39, %v3408_v23  ;;  %vm529_vm13 = vcmp.eq.s32.totalorder %v3521_v38, %v3416_v26 }
  0x33   : > { %2816 = vmatprep.subr.msk.bf16.mxu0 %vm2815_vm0, %v3262_v29  ;;  %vm2875_vm6 = vmpackc.low %vm528_vm15, %vm526_vm14  ;;  %vm531_vm14 = vcmp.eq.s32.totalorder %v3524_v39, %v3416_v26  ;;  %vm345_vm0 = vcmp.eq.s32.totalorder %v3618_v47, %v3404_v21 }
  0x34   : > { %vm2877_vm9 = vmpackc.low %vm527_vm2, %vm525_vm1  ;;  %2876 = vmatprep.subr.msk.bf16.mxu1 %vm2875_vm6, %v3262_v29  ;;  %vm347_vm1 = vcmp.eq.s32.totalorder %v3639_v49, %v3404_v21  ;;  %vm534_vm6 = vcmp.eq.s32.totalorder %v3577_v43, %v3408_v23 }
  0x35   : > { %1165 = vperm.xlu1 %3170, %v1087_v45   ;;  %1160 = vperm.xlu0 %3169, %v1086_v46   ;;  %vm2819_vm12 = vmpackc.low %vm343_vm5, %vm341_vm4  ;;  %vm346_vm4 = vcmp.eq.s32.totalorder %v3639_v49, %v3406_v22  ;;  %v3061_v45 = vld [vmem:[%s5399_s3 + $0xf0] sm:$0xff]  ;;  %v3072_v46 = vld [vmem:[%s5400_s4 + $0x88] sm:$0xff] }
  0x36   : > { %2818 = vmatpush1.bf16.msk.msra.mxu0 %vm3630_vm3, %v3262_v29  ;;  %2878 = vmatpush1.bf16.msk.msra.mxu1 %vm2877_vm9, %v3262_v29  ;;  %vm3694_vm15 = vmpackc.low %vm342_vm8, %vm340_vm7  ;;  %vm344_vm3 = vcmp.eq.s32.totalorder %v3618_v47, %v3406_v22  ;;  %vm536_vm7 = vcmp.eq.s32.totalorder %v3580_v44, %v3408_v23  ;;  %vm533_vm9 = vcmp.eq.s32.totalorder %v3577_v43, %v3416_v26 }
  0x37   : > { %2820 = vmatprep.subr.msk.bf16.mxu0 %vm2819_vm12, %v3262_v29  ;;  %vm2879_vm2 = vmpackc.low %vm532_vm11, %vm530_vm10  ;;  %vm535_vm10 = vcmp.eq.s32.totalorder %v3580_v44, %v3416_v26  ;;  %vm349_vm12 = vcmp.eq.s32.totalorder %v3682_v54, %v3404_v21 }
  0x38   : > { %vm2881_vm5 = vmpackc.low %vm531_vm14, %vm529_vm13  ;;  %2880 = vmatprep.subr.msk.bf16.mxu1 %vm2879_vm2, %v3262_v29  ;;  %vm351_vm13 = vcmp.eq.s32.totalorder %v3703_v56, %v3404_v21  ;;  %v1372_v21 = vld [vmem:[%s5400_s4 + $0x58] sm:$0xff] }
  0x39   : > { %1384 = vperm.xlu1 %3170, %v1362_v52   ;;  %1379 = vperm.xlu0 %3169, %v1361_v53   ;;  %vm2823_vm8 = vmpackc.low %vm347_vm1, %vm345_vm0  ;;  %vm350_vm0 = vcmp.eq.s32.totalorder %v3703_v56, %v3406_v22  ;;  %vm538_vm1 = vcmp.eq.s32.totalorder %v3618_v47, %v3408_v23  ;;  %v3078_v52 = vld [vmem:[%s5400_s4 + $0xb8] sm:$0xff]  ;;  %v3077_v53 = vld [vmem:[%s5400_s4 + $0xb0] sm:$0xff] }
  0x3a   : > { %2822 = vmatpush1.bf16.msk.msra.mxu0 %vm3694_vm15, %v3262_v29  ;;  %2882 = vmatpush1.bf16.msk.msra.mxu1 %vm2881_vm5, %v3262_v29  ;;  %vm3757_vm11 = vmpackc.low %vm346_vm4, %vm344_vm3  ;;  %vm348_vm15 = vcmp.eq.s32.totalorder %v3682_v54, %v3406_v22  ;;  %vm540_vm3 = vcmp.eq.s32.totalorder %v3639_v49, %v3408_v23  ;;  %vm537_vm5 = vcmp.eq.s32.totalorder %v3618_v47, %v3416_v26  ;;  %v1371_v22 = vld [vmem:[%s5400_s4 + $0x50] sm:$0xff] }
  0x3b   : > { %2824 = vmatprep.subr.msk.bf16.mxu0 %vm2823_vm8, %v3262_v29  ;;  %vm2883_vm14 = vmpackc.low %vm536_vm7, %vm534_vm6  ;;  %vm539_vm6 = vcmp.eq.s32.totalorder %v3639_v49, %v3416_v26  ;;  %vm695_vm8 = vcmp.eq.s32.totalorder %v3366_v4, %v3765_v0 }
  0x3c   : > { %vm2885_vm2 = vmpackc.low %vm535_vm10, %vm533_vm9  ;;  %2884 = vmatprep.subr.msk.bf16.mxu1 %vm2883_vm14, %v3262_v29  ;;  %vm697_vm9 = vcmp.eq.s32.totalorder %v3392_v14, %v3765_v0  ;;  %vm694_vm14 = vcmp.eq.s32.totalorder %v3366_v4, %v3788_v1 }
  0x3d   : > { %1394 = vperm.xlu1 %3170, %v1364_v60   ;;  %1389 = vperm.xlu0 %3169, %v1363_v61   ;;  %vm2827_vm4 = vmpackc.low %vm351_vm13, %vm349_vm12  ;;  %vm544_vm12 = vcmp.eq.s32.totalorder %v3703_v56, %v3408_v23  ;;  %v3086_v60 = vld [vmem:[%s5400_s4 + $0xf8] sm:$0xff]  ;;  %v3085_v61 = vld [vmem:[%s5400_s4 + $0xf0] sm:$0xff] }
  0x3e   : > { %2826 = vmatpush1.bf16.msk.msra.mxu0 %vm3757_vm11, %v3262_v29  ;;  %2886 = vmatpush1.bf16.msk.msra.mxu1 %vm2885_vm2, %v3262_v29  ;;  %vm3819_vm7 = vmpackc.low %vm350_vm0, %vm348_vm15  ;;  %vm542_vm11 = vcmp.eq.s32.totalorder %v3682_v54, %v3408_v23  ;;  %vm696_vm15 = vcmp.eq.s32.totalorder %v3392_v14, %v3788_v1  ;;  %vm543_vm2 = vcmp.eq.s32.totalorder %v3703_v56, %v3416_v26  ;;  %v3952_v23 = vld [vmem:[%s5397_s1 + $0x8] sm:$0xff]  }
  0x3f   : > { %2828 = vmatprep.subr.msk.bf16.mxu0 %vm2827_vm4, %v3262_v29  ;;  %vm2887_vm10 = vmpackc.low %vm540_vm3, %vm538_vm1  ;;  %vm541_vm1 = vcmp.eq.s32.totalorder %v3682_v54, %v3416_v26  ;;  %vm699_vm4 = vcmp.eq.s32.totalorder %v3399_v19, %v3765_v0  ;;  %v1375_v26 = vld [vmem:[%s5400_s4 + $0x70] sm:$0xff] }
  0x40   : > { %vm2889_vm13 = vmpackc.low %vm539_vm6, %vm537_vm5  ;;  %2888 = vmatprep.subr.msk.bf16.mxu1 %vm2887_vm10, %v3262_v29  ;;  %vm701_vm5 = vcmp.eq.s32.totalorder %v3402_v20, %v3765_v0  ;;  %vm876_vm10 = vcmp.eq.s32.totalorder %v3366_v4, %v3859_v13 }
  0x41   : > { %1404 = vperm.xlu1 %3170, %v1366_v6   ;;  %1399 = vperm.xlu0 %3169, %v1365_v7   ;;  %vm2927_vm0 = vmpackc.low %vm697_vm9, %vm695_vm8  ;;  %vm700_vm8 = vcmp.eq.s32.totalorder %v3402_v20, %v3788_v1  ;;  %v2158_v7 = vld [vmem:[%s5401_s5 + $0x28] sm:$0xff] }
  0x42   : > { %2830 = vmatpush1.bf16.msk.msra.mxu0 %vm3819_vm7, %v3262_v29  ;;  %2890 = vmatpush1.bf16.msk.msra.mxu1 %vm2889_vm13, %v3262_v29  ;;  %vm2891_vm3 = vmpackc.low %vm544_vm12, %vm542_vm11  ;;  %vm698_vm7 = vcmp.eq.s32.totalorder %v3399_v19, %v3788_v1  ;;  %vm878_vm11 = vcmp.eq.s32.totalorder %v3392_v14, %v3859_v13  ;;  %vm875_vm13 = vcmp.eq.s32.totalorder %v3366_v4, %v3872_v15 }
  0x43   : > { %2928 = vmatprep.subr.msk.bf16.mxu0 %vm2927_vm0, %v3262_v29  ;;  %2892 = vmatprep.subr.msk.bf16.mxu1 %vm2891_vm3, %v3262_v29  ;;  %vm2929_vm6 = vmpackc.low %vm696_vm15, %vm694_vm14  ;;  %vm877_vm14 = vcmp.eq.s32.totalorder %v3392_v14, %v3872_v15  ;;  %vm703_vm0 = vcmp.eq.s32.totalorder %v3419_v27, %v3765_v0  ;;  %vm702_vm3 = vcmp.eq.s32.totalorder %v3419_v27, %v3788_v1 }
  0x44   : > { %vm2893_vm9 = vmpackc.low %vm543_vm2, %vm541_vm1  ;;  %vm705_vm1 = vcmp.eq.s32.totalorder %v3422_v28, %v3765_v0 }
  0x45   : > { %1414 = vperm.xlu1 %3170, %v1368_v10   ;;  %1409 = vperm.xlu0 %3169, %v1367_v11   ;;  %vm2931_vm12 = vmpackc.low %vm701_vm5, %vm699_vm4  ;;  %vm704_vm4 = vcmp.eq.s32.totalorder %v3422_v28, %v3788_v1  ;;  %v2160_v10 = vld [vmem:[%s5401_s5 + $0x38] sm:$0xff]  ;;  %v2159_v11 = vld [vmem:[%s5401_s5 + $0x30] sm:$0xff] }
  0x46   : > { %477 = vmatmul.mubr.bf16.vlgmr.msra.gmra.mrb[0].mxu0 %v3853_v12  ;;  %2894 = vmatpush1.bf16.msk.msra.mxu1 %vm2893_vm9, %v3262_v29  ;;  %vm3923_vm15 = vmpackc.low %vm700_vm8, %vm698_vm7  ;;  %vm882_vm7 = vcmp.eq.s32.totalorder %v3402_v20, %v3859_v13  ;;  %vm879_vm9 = vcmp.eq.s32.totalorder %v3399_v19, %v3872_v15 }
  0x47   : > { %2930 = vmatpush1.bf16.msk.msra.mxu0 %vm2929_vm6, %v3262_v29  ;;  %vm2991_vm2 = vmpackc.low %vm878_vm11, %vm876_vm10  ;;  %486 = vmatprep.mubr.bf16.mxu0 %v5405_v3  ;;  %vm880_vm6 = vcmp.eq.s32.totalorder %v3399_v19, %v3859_v13  ;;  %vm881_vm10 = vcmp.eq.s32.totalorder %v3402_v20, %v3872_v15  ;;  %v1374_v20 = vld [vmem:[%s5400_s4 + $0x68] sm:$0xff] }
  0x48   : > { %2932 = vmatprep.subr.msk.bf16.mxu0 %vm2931_vm12, %v3262_v29  ;;  %vm2993_vm5 = vmpackc.low %vm877_vm14, %vm875_vm13  ;;  %2992 = vmatprep.subr.msk.bf16.mxu1 %vm2991_vm2, %v3262_v29  ;;  %vm707_vm12 = vcmp.eq.s32.totalorder %v3468_v33, %v3765_v0  ;;  %vm709_vm13 = vcmp.eq.s32.totalorder %v3471_v34, %v3765_v0  ;;  %vm884_vm2 = vcmp.eq.s32.totalorder %v3419_v27, %v3859_v13 }
  0x49   : > { %1424 = vperm.xlu1 %3170, %v1370_v16   ;;  %1419 = vperm.xlu0 %3169, %v1369_v17   ;;  %vm2935_vm8 = vmpackc.low %vm705_vm1, %vm703_vm0  ;;  %vm708_vm0 = vcmp.eq.s32.totalorder %v3471_v34, %v3788_v1  ;;  %v3087_v17 = vld [vmem:[%s5401_s5 + $0x80] sm:$0xff] }
  0x4a   : > { %658 = vmatmul.mubr.bf16.vlgmr.msra.gmra.mrb[0].mxu1 %v3853_v12  ;;  %vm3977_vm11 = vmpackc.low %vm704_vm4, %vm702_vm3  ;;  %vm886_vm3 = vcmp.eq.s32.totalorder %v3422_v28, %v3859_v13 }
  0x4b   : > { %2934 = vmatpush1.bf16.msk.msra.mxu0 %vm3923_vm15, %v3262_v29  ;;  %2994 = vmatpush1.bf16.msk.msra.mxu1 %vm2993_vm5, %v3262_v29  ;;  %vm2995_vm14 = vmpackc.low %vm882_vm7, %vm880_vm6  ;;  %vm706_vm15 = vcmp.eq.s32.totalorder %v3468_v33, %v3788_v1  ;;  %vm883_vm5 = vcmp.eq.s32.totalorder %v3419_v27, %v3872_v15  ;;  %vm885_vm6 = vcmp.eq.s32.totalorder %v3422_v28, %v3872_v15  ;;  %v3048_v28 = vld [vmem:[%s5399_s3 + $0x88] sm:$0xff] }
  0x4c   : > { %2936 = vmatprep.subr.msk.bf16.mxu0 %vm2935_vm8, %v3262_v29  ;;  %667 = vmatprep.mubr.bf16.mxu1 %v5405_v3  ;;  %vm2997_vm1 = vmpackc.low %vm881_vm10, %vm879_vm9  ;;  %vm711_vm8 = vcmp.eq.s32.totalorder %v3521_v38, %v3765_v0  ;;  %vm713_vm9 = vcmp.eq.s32.totalorder %v3524_v39, %v3765_v0 }
  0x4d   : > { %1434 = vperm.xlu1 %3170, %v1372_v21   ;;  %1429 = vperm.xlu0 %3169, %v1371_v22   ;;  %vm2939_vm4 = vmpackc.low %vm709_vm13, %vm707_vm12  ;;  %vm712_vm12 = vcmp.eq.s32.totalorder %v3524_v39, %v3788_v1  ;;  %v3089_v22 = vld [vmem:[%s5401_s5 + $0x90] sm:$0xff] }
  0x4e   : > { %487 = vmatmul.mubr.bf16.gmra.mrb[4].mxu0 %v3952_v23  ;;  %2996 = vmatprep.subr.msk.bf16.mxu1 %vm2995_vm14, %v3262_v29  ;;  %vm4026_vm7 = vmpackc.low %vm708_vm0, %vm706_vm15  ;;  %vm888_vm14 = vcmp.eq.s32.totalorder %v3468_v33, %v3859_v13  ;;  %vm890_vm15 = vcmp.eq.s32.totalorder %v3471_v34, %v3859_v13 }
  0x4f   : > { %2938 = vmatpush1.bf16.msk.msra.mxu0 %vm3977_vm11, %v3262_v29  ;;  %2998 = vmatpush1.bf16.msk.msra.mxu1 %vm2997_vm1, %v3262_v29  ;;  %vm2999_vm10 = vmpackc.low %vm886_vm3, %vm884_vm2  ;;  %vm710_vm11 = vcmp.eq.s32.totalorder %v3521_v38, %v3788_v1  ;;  %vm887_vm1 = vcmp.eq.s32.totalorder %v3468_v33, %v3872_v15  ;;  %vm889_vm2 = vcmp.eq.s32.totalorder %v3471_v34, %v3872_v15  ;;  %v3049_v33 = vld [vmem:[%s5399_s3 + $0x90] sm:$0xff] }
  0x50   : > { %2940 = vmatprep.subr.msk.bf16.mxu0 %vm2939_vm4, %v3262_v29  ;;  %838 = vmatprep.mubr.bf16.mxu0 %v5405_v3  ;;  %vm3001_vm13 = vmpackc.low %vm885_vm6, %vm883_vm5  ;;  %vm715_vm4 = vcmp.eq.s32.totalorder %v3577_v43, %v3765_v0  ;;  %vm717_vm5 = vcmp.eq.s32.totalorder %v3580_v44, %v3765_v0 }
  0x51   : > { %1444 = vperm.xlu1 %3170, %v1374_v20   ;;  %1439 = vperm.xlu0 %3169, %v1373_v24   ;;  %vm2943_vm0 = vmpackc.low %vm713_vm9, %vm711_vm8  ;;  %vm716_vm8 = vcmp.eq.s32.totalorder %v3580_v44, %v3788_v1  ;;  %v3104_v20 = vld [vmem:[%s5401_s5 + $0x108] sm:$0xff]  ;;  %v3103_v24 = vld [vmem:[%s5401_s5 + $0x100] sm:$0xff] }
  0x52   : > { %3000 = vmatprep.subr.msk.bf16.mxu1 %vm2999_vm10, %v3262_v29  ;;  %668 = vmatmul.mubr.bf16.gmra.mrb[4].mxu1 %v3952_v23  ;;  %vm4075_vm3 = vmpackc.low %vm712_vm12, %vm710_vm11  ;;  %vm892_vm10 = vcmp.eq.s32.totalorder %v3521_v38, %v3859_v13  ;;  %vm894_vm11 = vcmp.eq.s32.totalorder %v3524_v39, %v3859_v13 }
  0x53   : > { %2942 = vmatpush1.bf16.msk.msra.mxu0 %vm4026_vm7, %v3262_v29  ;;  %3002 = vmatpush1.bf16.msk.msra.mxu1 %vm3001_vm13, %v3262_v29  ;;  %vm3003_vm6 = vmpackc.low %vm890_vm15, %vm888_vm14  ;;  %vm714_vm7 = vcmp.eq.s32.totalorder %v3577_v43, %v3788_v1  ;;  %vm891_vm13 = vcmp.eq.s32.totalorder %v3521_v38, %v3872_v15  ;;  %vm893_vm14 = vcmp.eq.s32.totalorder %v3524_v39, %v3872_v15  ;;  %v3053_v38 = vld [vmem:[%s5399_s3 + $0xb0] sm:$0xff]  ;;  %v3056_v39 = vld [vmem:[%s5399_s3 + $0xc8] sm:$0xff] }
  0x54   : > { %2944 = vmatprep.subr.msk.bf16.mxu0 %vm2943_vm0, %v3262_v29  ;;  %1019 = vmatprep.mubr.bf16.mxu1 %v5405_v3  ;;  %vm3005_vm9 = vmpackc.low %vm889_vm2, %vm887_vm1  ;;  %vm719_vm0 = vcmp.eq.s32.totalorder %v3618_v47, %v3765_v0  ;;  %vm721_vm1 = vcmp.eq.s32.totalorder %v3639_v49, %v3765_v0 }
  0x55   : > { %1454 = vperm.xlu1 %3170, %v1376_v25   ;;  %1449 = vperm.xlu0 %3169, %v1375_v26   ;;  %vm2947_vm12 = vmpackc.low %vm717_vm5, %vm715_vm4  ;;  %vm720_vm4 = vcmp.eq.s32.totalorder %v3639_v49, %v3788_v1  ;;  %v3105_v25 = vld [vmem:[%s5401_s5 + $0x110] sm:$0xff]  ;;  %v3090_v26 = vld [vmem:[%s5401_s5 + $0x98] sm:$0xff] }
  0x56   : > { %3004 = vmatprep.subr.msk.bf16.mxu1 %vm3003_vm6, %v3262_v29  ;;  %vm4117_vm15 = vmpackc.low %vm716_vm8, %vm714_vm7  ;;  %vm896_vm6 = vcmp.eq.s32.totalorder %v3577_v43, %v3859_v13  ;;  %vm898_vm7 = vcmp.eq.s32.totalorder %v3580_v44, %v3859_v13 }
  0x57   : > { %2946 = vmatpush1.bf16.msk.msra.mxu0 %vm4075_vm3, %v3262_v29  ;;  %3006 = vmatpush1.bf16.msk.msra.mxu1 %vm3005_vm9, %v3262_v29  ;;  %vm3007_vm2 = vmpackc.low %vm894_vm11, %vm892_vm10  ;;  %vm718_vm3 = vcmp.eq.s32.totalorder %v3618_v47, %v3788_v1  ;;  %vm895_vm9 = vcmp.eq.s32.totalorder %v3577_v43, %v3872_v15  ;;  %vm897_vm10 = vcmp.eq.s32.totalorder %v3580_v44, %v3872_v15  ;;  %v3059_v43 = vld [vmem:[%s5399_s3 + $0xe0] sm:$0xff]  ;;  %v3062_v44 = vld [vmem:[%s5399_s3 + $0xf8] sm:$0xff] }
  0x58   : > { %2948 = vmatprep.subr.msk.bf16.mxu0 %vm2947_vm12, %v3262_v29  ;;  %vm3009_vm5 = vmpackc.low %vm893_vm14, %vm891_vm13  ;;  %3008 = vmatprep.subr.msk.bf16.mxu1 %vm3007_vm2, %v3262_v29  ;;  %vm723_vm12 = vcmp.eq.s32.totalorder %v3682_v54, %v3765_v0  ;;  %vm725_vm13 = vcmp.eq.s32.totalorder %v3703_v56, %v3765_v0  ;;  %vm900_vm2 = vcmp.eq.s32.totalorder %v3618_v47, %v3859_v13 }
  0x59   : > { %1652 = vperm.xlu1 %3170, %v3048_v28   ;;  %1647 = vperm.xlu0 %3169, %v3047_v30   ;;  %vm2951_vm8 = vmpackc.low %vm721_vm1, %vm719_vm0  ;;  %vm724_vm0 = vcmp.eq.s32.totalorder %v3703_v56, %v3788_v1  ;;  %v3106_v28 = vld [vmem:[%s5401_s5 + $0x118] sm:$0xff]  ;;  %v3091_v30 = vld [vmem:[%s5401_s5 + $0xa0] sm:$0xff] }
  0x5a   : > { %vm4152_vm11 = vmpackc.low %vm720_vm4, %vm718_vm3  ;;  %vm902_vm3 = vcmp.eq.s32.totalorder %v3639_v49, %v3859_v13 }
  0x5b   : > { %2950 = vmatpush1.bf16.msk.msra.mxu0 %vm4117_vm15, %v3262_v29  ;;  %3010 = vmatpush1.bf16.msk.msra.mxu1 %vm3009_vm5, %v3262_v29  ;;  %vm3011_vm14 = vmpackc.low %vm898_vm7, %vm896_vm6  ;;  %vm722_vm15 = vcmp.eq.s32.totalorder %v3682_v54, %v3788_v1  ;;  %vm899_vm5 = vcmp.eq.s32.totalorder %v3618_v47, %v3872_v15  ;;  %vm901_vm6 = vcmp.eq.s32.totalorder %v3639_v49, %v3872_v15  ;;  %v3071_v47 = vld [vmem:[%s5400_s4 + $0x80] sm:$0xff]  ;;  %v3073_v49 = vld [vmem:[%s5400_s4 + $0x90] sm:$0xff] }
  0x5c   : > { %2952 = vmatprep.subr.msk.bf16.mxu0 %vm2951_vm8, %v3262_v29  ;;  %vm3013_vm1 = vmpackc.low %vm897_vm10, %vm895_vm9  ;;  %3012 = vmatprep.subr.msk.bf16.mxu1 %vm3011_vm14, %v3262_v29  ;;  %vm904_vm8 = vcmp.eq.s32.totalorder %v3682_v54, %v3859_v13  ;;  %vm906_vm9 = vcmp.eq.s32.totalorder %v3703_v56, %v3859_v13  ;;  %v2156_v1 = vld [vmem:[%s5401_s5 + $0x18] sm:$0xff]  ;;  %v2162_v13 = vld [vmem:[%s5401_s5 + $0x48] sm:$0xff] }
  0x5d   : > { %1662 = vperm.xlu1 %3170, %v3050_v32   ;;  %1657 = vperm.xlu0 %3169, %v3049_v33   ;;  %vm2955_vm4 = vmpackc.low %vm725_vm13, %vm723_vm12  ;;  %vm905_vm13 = vcmp.eq.s32.totalorder %v3703_v56, %v3872_v15  ;;  %v3082_v56 = vld [vmem:[%s5400_s4 + $0xd8] sm:$0xff]  ;;  %v3107_v32 = vld [vmem:[%s5401_s5 + $0x120] sm:$0xff] }
  0x5e   : > { %vm2957_vm7 = vmpackc.low %vm724_vm0, %vm722_vm15  ;;  %v3092_v33 = vld [vmem:[%s5401_s5 + $0xa8] sm:$0xff] }
  0x5f   : > { %2954 = vmatpush1.bf16.msk.msra.mxu0 %vm4152_vm11, %v3262_v29  ;;  %3014 = vmatpush1.bf16.msk.msra.mxu1 %vm3013_vm1, %v3262_v29  ;;  %vm3015_vm10 = vmpackc.low %vm902_vm3, %vm900_vm2  ;;  %vm903_vm11 = vcmp.eq.s32.totalorder %v3682_v54, %v3872_v15  ;;  %v3080_v54 = vld [vmem:[%s5400_s4 + $0xc8] sm:$0xff]  ;;  %v2161_v15 = vld [vmem:[%s5401_s5 + $0x40] sm:$0xff] }
  0x60   : > { %2956 = vmatprep.subr.msk.bf16.mxu0 %vm2955_vm4, %v3262_v29  ;;  %vm3017_vm12 = vmpackc.low %vm901_vm6, %vm899_vm5  ;;  %3016 = vmatprep.subr.msk.bf16.mxu1 %vm3015_vm10, %v3262_v29 }
  0x61   : > { %1672 = vperm.xlu1 %3170, %v3052_v35   ;;  %1667 = vperm.xlu0 %3169, %v3051_v36   ;;  %vm3019_vm14 = vmpackc.low %vm906_vm9, %vm904_vm8  ;;  %v3108_v35 = vld [vmem:[%s5401_s5 + $0x128] sm:$0xff]  ;;  %v3093_v36 = vld [vmem:[%s5401_s5 + $0xb0] sm:$0xff] }
  0x62   : > { %vm3021_vm15 = vmpackc.low %vm905_vm13, %vm903_vm11 }
  0x63   : > { %2958 = vmatpush1.bf16.msk.msra.mxu0 %vm2957_vm7, %v3262_v29  ;;  %3018 = vmatpush1.bf16.msk.msra.mxu1 %vm3017_vm12, %v3262_v29 }
  0x64   : > { %3020 = vmatprep.subr.msk.bf16.mxu1 %vm3019_vm14, %v3262_v29 }
  0x65   : > { %1682 = vperm.xlu1 %3170, %v3054_v37   ;;  %1677 = vperm.xlu0 %3169, %v3053_v38   ;;  %v3109_v38 = vld [vmem:[%s5401_s5 + $0x130] sm:$0xff] }
  0x66   : > { %839 = vmatmul.mubr.bf16.vlgmr.msra.gmra.mrb[8].mxu0 %v3853_v12 }
  0x67   : > { %3022 = vmatpush1.bf16.msk.msra.mxu1 %vm3021_vm15, %v3262_v29  ;;  %848 = vmatprep.mubr.bf16.mxu0 %v5405_v3  ;;  %v3060_v29 = vld [vmem:[%s5399_s3 + $0xe8] sm:$0xff] }
  0x69   : > { %1692 = vperm.xlu1 %3170, %v3056_v39   ;;  %1687 = vperm.xlu0 %3169, %v3055_v40   ;;  %v3094_v39 = vld [vmem:[%s5401_s5 + $0xb8] sm:$0xff] }
  0x6a   : > { %1020 = vmatmul.mubr.bf16.vlgmr.msra.gmra.mrb[8].mxu1 %v3853_v12 }
  0x6b   : > { %1029 = vmatprep.mubr.bf16.mxu1 %v5405_v3 }
  0x6d   : > { %1702 = vperm.xlu1 %3170, %v3058_v41   ;;  %1697 = vperm.xlu0 %3169, %v3057_v42   ;;  %v3110_v42 = vld [vmem:[%s5401_s5 + $0x138] sm:$0xff] }
  0x6e   : > { %849 = vmatmul.mubr.bf16.gmra.mrb[12].mxu0 %v3952_v23 }
  0x6f   : > { %1248 = vmatprep.mubr.bf16.mxu0 %v5405_v3 }
  0x71   : > { %1712 = vperm.xlu1 %3170, %v3060_v29   ;;  %1707 = vperm.xlu0 %3169, %v3059_v43   ;;  %v3095_v29 = vld [vmem:[%s5401_s5 + $0xc0] sm:$0xff] }
  0x72   : > { %1030 = vmatmul.mubr.bf16.gmra.mrb[12].mxu1 %v3952_v23  ;;  %v3088_v23 = vld [vmem:[%s5401_s5 + $0x88] sm:$0xff] }
  0x73   : > { %1805 = vmatprep.mubr.bf16.mxu1 %v5405_v3 }
  0x75   : > { %1722 = vperm.xlu1 %3170, %v3062_v44   ;;  %1717 = vperm.xlu0 %3169, %v3061_v45   ;;  %v3111_v45 = vld [vmem:[%s5401_s5 + $0x140] sm:$0xff] }
  0x79   : > { %1942 = vperm.xlu1 %3170, %v3072_v46   ;;  %1937 = vperm.xlu0 %3169, %v3071_v47   ;;  %v3096_v46 = vld [vmem:[%s5401_s5 + $0xc8] sm:$0xff] }
  0x7d   : > { %1952 = vperm.xlu1 %3170, %v3074_v48   ;;  %1947 = vperm.xlu0 %3169, %v3073_v49   ;;  %v3112_v48 = vld [vmem:[%s5401_s5 + $0x148] sm:$0xff]  ;;  %v3097_v49 = vld [vmem:[%s5401_s5 + $0xd0] sm:$0xff] }
  0x81   : > { %1962 = vperm.xlu1 %3170, %v3076_v50   ;;  %1957 = vperm.xlu0 %3169, %v3075_v51  }
  0x85   : > { %1972 = vperm.xlu1 %3170, %v3078_v52   ;;  %1967 = vperm.xlu0 %3169, %v3077_v53   ;;  %v3098_v52 = vld [vmem:[%s5401_s5 + $0xd8] sm:$0xff] }
  0x86   : > { %v2164_v53 = vld [vmem:[%s5401_s5 + $0x58] sm:$0xff] }
  0x89   : > { %1982 = vperm.xlu1 %3170, %v3080_v54   ;;  %1977 = vperm.xlu0 %3169, %v3079_v55  }
  0x8d   : > { %1992 = vperm.xlu1 %3170, %v3082_v56   ;;  %1987 = vperm.xlu0 %3169, %v3081_v57   ;;  %v2165_v56 = vld [vmem:[%s5401_s5 + $0x60] sm:$0xff]  ;;  %v3113_v57 = vld [vmem:[%s5401_s5 + $0x150] sm:$0xff] }
  0x91   : > { %2002 = vperm.xlu1 %3170, %v3084_v58   ;;  %1997 = vperm.xlu0 %3169, %v3083_v59   ;;  %v3114_v59 = vld [vmem:[%s5401_s5 + $0x158] sm:$0xff] }
  0x95   : > { %2012 = vperm.xlu1 %3170, %v3086_v60   ;;  %2007 = vperm.xlu0 %3169, %v3085_v61   ;;  %v3099_v60 = vld [vmem:[%s5401_s5 + $0xe0] sm:$0xff] }
  0x98   : > { %v4293_v0 = vpop.permute.xlu0 %1090  ;;  %v4389_v40 = vpop.permute.xlu1 %1100 }
  0x99   : > { %5531 = vst [vmem:[#allocation7_spill] sm:$0xff] %v4293_v0  ;;  %2176 = vperm.xlu1 %3170, %v2154_v62   ;;  %2171 = vperm.xlu0 %3169, %v2153_v63   ;;  %5539 = vst [vmem:[#allocation15_spill] sm:$0xff] %v4389_v40  ;;  %v3100_v63 = vld [vmem:[%s5401_s5 + $0xe8] sm:$0xff] }
  0x9c   : > { %v4301_v6 = vpop.permute.xlu0 %1095  ;;  %v4401_v44 = vpop.permute.xlu1 %1105 }
  0x9d   : > { %5532 = vst [vmem:[#allocation8_spill] sm:$0xff] %v4301_v6  ;;  %2186 = vperm.xlu1 %3170, %v2156_v1   ;;  %2181 = vperm.xlu0 %3169, %v2155_v5   ;;  %5540 = vst [vmem:[#allocation16_spill] sm:$0xff] %v4401_v44  ;;  %v2166_v1 = vld [vmem:[%s5401_s5 + $0x68] sm:$0xff] }
  0xa0   : > { %v4309_v9 = vpop.permute.xlu0 %1110  ;;  %v4417_v50 = vpop.permute.xlu1 %1115 }
  0xa1   : > { %5533 = vst [vmem:[#allocation9_spill] sm:$0xff] %v4309_v9  ;;  %2196 = vperm.xlu1 %3170, %v2158_v7   ;;  %2191 = vperm.xlu0 %3169, %v2157_v8   ;;  %5541 = vst [vmem:[#allocation17_spill] sm:$0xff] %v4417_v50  ;;  %v2167_v8 = vld [vmem:[%s5401_s5 + $0x70] sm:$0xff] }
  0xa4   : > { %v4317_v12 = vpop.permute.xlu0 %1120  ;;  %v4429_v55 = vpop.permute.xlu1 %1125 }
  0xa5   : > { %5534 = vst [vmem:[#allocation10_spill] sm:$0xff] %v4317_v12  ;;  %2206 = vperm.xlu1 %3170, %v2160_v10   ;;  %2201 = vperm.xlu0 %3169, %v2159_v11   ;;  %5543 = vst [vmem:[#allocation19_spill] sm:$0xff] %v4429_v55  ;;  %v3115_v10 = vld [vmem:[%s5401_s5 + $0x160] sm:$0xff] }
  0xa8   : > { %v4325_v16 = vpop.permute.xlu0 %1130  ;;  %v4445_v61 = vpop.permute.xlu1 %1135 }
  0xa9   : > { %5535 = vst [vmem:[#allocation11_spill] sm:$0xff] %v4325_v16  ;;  %2216 = vperm.xlu1 %3170, %v2162_v13   ;;  %2211 = vperm.xlu0 %3169, %v2161_v15   ;;  %5545 = vst [vmem:[#allocation21_spill] sm:$0xff] %v4445_v61  ;;  %v3101_v13 = vld [vmem:[%s5401_s5 + $0xf0] sm:$0xff]  ;;  %v3116_v15 = vld [vmem:[%s5401_s5 + $0x168] sm:$0xff] }
  0xac   : > { %v4333_v21 = vpop.permute.xlu0 %1140  ;;  %v4457_v7 = vpop.permute.xlu1 %1145 }
  0xad   : > { %5536 = vst [vmem:[#allocation12_spill] sm:$0xff] %v4333_v21  ;;  %2300 = vperm.xlu1 %3170, %v3087_v17   ;;  %2221 = vperm.xlu0 %3169, %v2163_v18   ;;  %5548 = vst [vmem:[#allocation24_spill] sm:$0xff] %v4457_v7 }
  0xb0   : > { %v4341_v14 = vpop.permute.xlu0 %1150  ;;  %v4473_v17 = vpop.permute.xlu1 %1155 }
  0xb1   : > { %5537 = vst [vmem:[#allocation13_spill] sm:$0xff] %v4341_v14  ;;  %2310 = vperm.xlu1 %3170, %v3089_v22   ;;  %2305 = vperm.xlu0 %3169, %v3088_v23   ;;  %5550 = vst [vmem:[#allocation26_spill] sm:$0xff] %v4473_v17  ;;  %v2168_v22 = vld [vmem:[%s5401_s5 + $0x78] sm:$0xff] }
  0xb2   : > { %v3102_v23 = vld [vmem:[%s5401_s5 + $0xf8] sm:$0xff] }
  0xb4   : > { %v4349_v19 = vpop.permute.xlu0 %1160 }
  0xb5   : > { %5538 = vst [vmem:[#allocation14_spill] sm:$0xff] %v4349_v19  ;;  %2466 = vperm.xlu1 %3170, %v3104_v20   ;;  %2461 = vperm.xlu0 %3169, %v3103_v24   ;;  %v4485_v24 = vpop.permute.xlu1 %1165 }
  0xb6   : > { %5553 = vst [vmem:[#allocation29_spill] sm:$0xff] %v4485_v24 }
  0xb8   : > { %v4357_v27 = vpop.permute.xlu0 %1379 }
  0xb9   : > { %2471 = vperm.xlu1 %3170, %v3105_v25   ;;  %2315 = vperm.xlu0 %3169, %v3090_v26   ;;  %v3118_v25 = vld [vmem:[%s5401_s5 + $0x178] sm:$0xff]  ;;  %v3117_v26 = vld [vmem:[%s5401_s5 + $0x170] sm:$0xff] }
  0xbc   : > { %v4365_v31 = vpop.permute.xlu0 %1389 }
  0xbd   : > { %2476 = vperm.xlu1 %3170, %v3106_v28   ;;  %2320 = vperm.xlu0 %3169, %v3091_v30   ;;  %v1385_v30 = vpop.permute.xlu1 %1384 }
  0xc0   : > { %v4373_v34 = vpop.permute.xlu0 %1399 }
  0xc1   : > { %2481 = vperm.xlu1 %3170, %v3107_v32   ;;  %2325 = vperm.xlu0 %3169, %v3092_v33  }
  0xc4   : > { %v4381_v37 = vpop.permute.xlu0 %1409 }
  0xc5   : > { %2486 = vperm.xlu1 %3170, %v3108_v35   ;;  %2330 = vperm.xlu0 %3169, %v3093_v36   ;;  %v1395_v35 = vpop.permute.xlu1 %1394 }
  0xc8   : > { %v4391_v41 = vpop.permute.xlu0 %1419 }
  0xc9   : > { %2491 = vperm.xlu1 %3170, %v3109_v38   ;;  %2335 = vperm.xlu0 %3169, %v3094_v39   ;;  %v1405_v38 = vpop.permute.xlu1 %1404 }
  0xcc   : > { %v4399_v43 = vpop.permute.xlu0 %1429 }
  0xcd   : > { %2496 = vperm.xlu1 %3170, %v3110_v42   ;;  %2340 = vperm.xlu0 %3169, %v3095_v29   ;;  %v4505_v29 = vpop.permute.xlu1 %1414 }
  0xd0   : > { %v4409_v47 = vpop.permute.xlu0 %1439 }
  0xd1   : > { %2501 = vperm.xlu1 %3170, %v3111_v45   ;;  %2345 = vperm.xlu0 %3169, %v3096_v46   ;;  %v4509_v46 = vpop.permute.xlu1 %1424 }
  0xd4   : > { %v4419_v51 = vpop.permute.xlu0 %1449 }
  0xd5   : > { %2506 = vperm.xlu1 %3170, %v3112_v48   ;;  %2350 = vperm.xlu0 %3169, %v3097_v49  }
  0xd8   : > { %v4427_v54 = vpop.permute.xlu0 %1647 }
  0xd9   : > { %5542 = vst [vmem:[#allocation18_spill] sm:$0xff] %v4427_v54  ;;  %2355 = vperm.xlu1 %3170, %v3098_v52   ;;  %2226 = vperm.xlu0 %3169, %v2164_v53   ;;  %v4515_v52 = vpop.permute.xlu1 %1434 }
  0xdc   : > { %v4437_v58 = vpop.permute.xlu0 %1657 }
  0xdd   : > { %5544 = vst [vmem:[#allocation20_spill] sm:$0xff] %v4437_v58  ;;  %2231 = vperm.xlu1 %3170, %v2165_v56   ;;  %2511 = vperm.xlu0 %3169, %v3113_v57  }
  0xe0   : > { %v4447_v62 = vpop.permute.xlu0 %1667 }
  0xe1   : > { %5546 = vst [vmem:[#allocation22_spill] sm:$0xff] %v4447_v62  ;;  %2516 = vperm.xlu1 %3170, %v3114_v59   ;;  %2360 = vperm.xlu0 %3169, %v3099_v60  }
  0xe4   : > { %v4455_v5 = vpop.permute.xlu0 %1677 }
  0xe5   : > { %5547 = vst [vmem:[#allocation23_spill] sm:$0xff] %v4455_v5  ;;  %2365 = vperm.xlu1 %3170, %v3100_v63   ;;  %2236 = vperm.xlu0 %3169, %v2166_v1   ;;  %v4526_v63 = vpop.permute.xlu1 %1444 }
  0xe8   : > { %v4465_v11 = vpop.permute.xlu0 %1687 }
  0xe9   : > { %5549 = vst [vmem:[#allocation25_spill] sm:$0xff] %v4465_v11  ;;  %2241 = vperm.xlu1 %3170, %v2167_v8   ;;  %2521 = vperm.xlu0 %3169, %v3115_v10  }
  0xec   : > { %v4475_v18 = vpop.permute.xlu0 %1697 }
  0xed   : > { %5551 = vst [vmem:[#allocation27_spill] sm:$0xff] %v4475_v18  ;;  %2370 = vperm.xlu0 %3169, %v3101_v13   ;;  %2526 = vperm.xlu1 %3170, %v3116_v15  }
  0xf0   : > { %v4483_v20 = vpop.permute.xlu0 %1707 }
  0xf1   : > { %5552 = vst [vmem:[#allocation28_spill] sm:$0xff] %v4483_v20  ;;  %2246 = vperm.xlu0 %3169, %v2168_v22   ;;  %2375 = vperm.xlu1 %3170, %v3102_v23  }
  0xf4   : > { %v4493_v28 = vpop.permute.xlu0 %1717 }
  0xf5   : > { %5554 = vst [vmem:[#allocation30_spill] sm:$0xff] %v4493_v28  ;;  %2536 = vperm.xlu1 %3170, %v3118_v25   ;;  %2531 = vperm.xlu0 %3169, %v3117_v26  }
  0xf8   : > { %v4495_v32 = vpop.permute.xlu0 %1937 }
  0xfc   : > { %v4497_v33 = vpop.permute.xlu0 %1947 }
 0x100   : > { %v4499_v36 = vpop.permute.xlu0 %1957 }
 0x104   : > { %v4501_v39 = vpop.permute.xlu0 %1967 }
 0x108   : > { %v4503_v42 = vpop.permute.xlu0 %1977 }
 0x10c   : > { %v4507_v45 = vpop.permute.xlu0 %1987 }
 0x110   : > { %v4511_v48 = vpop.permute.xlu0 %1997 }
 0x114   : > { %v4513_v49 = vpop.permute.xlu0 %2007 }
 0x118   : > { %v2172_v53 = vpop.permute.xlu0 %2171 }
 0x119   : > { %v4517_v56 = vpop.f32.mrb[0].mxu0 }
 0x11a   : > { %5555 = vst [vmem:[#allocation31_spill] sm:$0xff] %v4517_v56  ;;  %v1457_v57 = vmul.f32 %v4357_v27, %v4517_v56  ;;  %v4521_v59 = vpop.f32.mrb[1].mxu0  ;;  %v4524_v60 = vmul.f32 %v2172_v53, %v4517_v56 }
 0x11b   : > { %v1458_v1 = vmul.f32 %v4357_v27, %v4521_v59  ;;  %v4530_v8 = vpop.f32.mrb[2].mxu0  ;;  %v4533_v10 = vmul.f32 %v2172_v53, %v4521_v59 }
 0x11c   : > { %5556 = vst [vmem:[#allocation32_spill] sm:$0xff] %v4524_v60  ;;  %5557 = vst [vmem:[#allocation33_spill] sm:$0xff] %v4530_v8  ;;  %v1459_v13 = vmul.f32 %v1385_v30, %v4530_v8  ;;  %v4536_v15 = vpop.f32.mrb[3].mxu0  ;;  %v1056_v22 = vpack.c.bf16 %v4530_v8, %v4517_v56 }
 0x11d   : > { %5558 = vst [vmem:[#allocation34_spill] sm:$0xff] %v4533_v10  ;;  %v1460_v23 = vmul.f32 %v1385_v30, %v4536_v15  ;;  %v4541_v25 = vpop.f32.mrb[0].mxu1  ;;  %v1057_v26 = vpack.c.bf16 %v4536_v15, %v4521_v59 }
 0x11e   : > { %5559 = vst [vmem:[#allocation35_spill] sm:$0xff] %v4541_v25  ;;  %v1489_v27 = vadd.f32 %v1459_v13, %v1457_v57  ;;  %v1465_v2 = vmul.f32 %v4373_v34, %v4541_v25  ;;  %v4547_v53 = vpop.f32.mrb[1].mxu1  ;;  %v4558_v13 = vpop.permute.xlu1 %1454 }
 0x11f   : > { %5560 = vst [vmem:[#allocation36_spill] sm:$0xff] %v4547_v53  ;;  %v1510_v3 = vadd.f32 %v1460_v23, %v1458_v1  ;;  %1216 = vmatprep.subr.bf16.mxu0 %v1057_v26  ;;  %v1466_v4 = vmul.f32 %v4373_v34, %v4547_v53  ;;  %v4551_v28 = vpop.f32.mrb[2].mxu1 }
 0x120   : > { %5561 = vst [vmem:[#allocation37_spill] sm:$0xff] %v4551_v28  ;;  %1217 = vmatpush1.bf16.msra.mxu0 %v1056_v22  ;;  %v1467_v30 = vmul.f32 %v1405_v38, %v4551_v28  ;;  %v4554_v20 = vpop.f32.mrb[3].mxu1  ;;  %v1060_v57 = vpack.c.bf16 %v4551_v28, %v4541_v25 }
 0x121   : > { %5562 = vst [vmem:[#allocation38_spill] sm:$0xff] %v4554_v20  ;;  %v4560_v18 = vpop.f32.mrb[4].mxu0  ;;  %v1468_v1 = vmul.f32 %v1405_v38, %v4554_v20  ;;  %v1061_v23 = vpack.c.bf16 %v4554_v20, %v4547_v53 }
 0x122   : > { %5563 = vst [vmem:[#allocation39_spill] sm:$0xff] %v4560_v18  ;;  %v1461_v34 = vmul.f32 %v4365_v31, %v4560_v18  ;;  %v4567_v22 = vpop.f32.mrb[5].mxu0 }
 0x123   : > { %v1462_v26 = vmul.f32 %v4365_v31, %v4567_v22  ;;  %v4571_v11 = vpop.f32.mrb[6].mxu0 }
 0x124   : > { %5564 = vst [vmem:[#allocation40_spill] sm:$0xff] %v4571_v11  ;;  %v1490_v5 = vadd.f32 %v1489_v27, %v1461_v34  ;;  %v1463_v62 = vmul.f32 %v1395_v35, %v4571_v11  ;;  %v4574_v58 = vpop.f32.mrb[7].mxu0  ;;  %v1058_v38 = vpack.c.bf16 %v4571_v11, %v4560_v18  ;;  %v4587_v34 = vpop.permute.xlu1 %1652 }
 0x125   : > { %v1511_v10 = vadd.f32 %v1510_v3, %v1462_v26  ;;  %v1464_v60 = vmul.f32 %v1395_v35, %v4574_v58  ;;  %v1059_v54 = vpack.c.bf16 %v4574_v58, %v4567_v22  ;;  %v4581_v24 = vpop.f32.mrb[4].mxu1  ;;  %5566 = vst [vmem:[#allocation42_spill] sm:$0xff] %v4587_v34 }
 0x126   : > { %v1491_v19 = vadd.f32 %v1490_v5, %v1463_v62  ;;  %v1469_v31 = vmul.f32 %v4381_v37, %v4581_v24  ;;  %v4585_v27 = vpop.f32.mrb[5].mxu1 }
 0x127   : > { %5565 = vst [vmem:[#allocation41_spill] sm:$0xff] %v4585_v27  ;;  %v1512_v17 = vadd.f32 %v1511_v10, %v1464_v60  ;;  %1218 = vmatprep.subr.bf16.mxu0 %v1059_v54  ;;  %v1470_v3 = vmul.f32 %v4381_v37, %v4585_v27  ;;  %v4591_v26 = vpop.f32.mrb[6].mxu1 }
 0x128   : > { %5567 = vst [vmem:[#allocation43_spill] sm:$0xff] %v4591_v26  ;;  %v1492_v35 = vadd.f32 %v1491_v19, %v1465_v2  ;;  %1219 = vmatpush1.bf16.msra.mxu0 %v1058_v38  ;;  %v1471_v14 = vmul.f32 %v4505_v29, %v4591_v26  ;;  %v4595_v62 = vpop.f32.mrb[7].mxu1  ;;  %v1062_v5 = vpack.c.bf16 %v4591_v26, %v4581_v24  ;;  %v4603_v19 = vpop.permute.xlu1 %1662 }
 0x129   : > { %5568 = vst [vmem:[#allocation44_spill] sm:$0xff] %v4595_v62  ;;  %v1513_v7 = vadd.f32 %v1512_v17, %v1466_v4  ;;  %1220 = vmatprep.subr.bf16.mxu0 %v1061_v23  ;;  %v1472_v54 = vmul.f32 %v4505_v29, %v4595_v62  ;;  %v1063_v37 = vpack.c.bf16 %v4595_v62, %v4585_v27  ;;  %5569 = vst [vmem:[#allocation45_spill] sm:$0xff] %v4603_v19 }
 0x12a   : > { %v1493_v60 = vadd.f32 %v1492_v35, %v1467_v30 }
 0x12b   : > { %v1514_v10 = vadd.f32 %v1513_v7, %v1468_v1 }
 0x12c   : > { %v1494_v2 = vadd.f32 %v1493_v60, %v1469_v31  ;;  %1221 = vmatpush1.bf16.msra.mxu0 %v1060_v57  ;;  %v4605_v61 = vpop.permute.xlu1 %1672 }
 0x12d   : > { %v1515_v38 = vadd.f32 %v1514_v10, %v1470_v3  ;;  %1222 = vmatprep.subr.bf16.mxu0 %v1063_v37  ;;  %5570 = vst [vmem:[#allocation46_spill] sm:$0xff] %v4605_v61 }
 0x12e   : > { %v1495_v34 = vadd.f32 %v1494_v2, %v1471_v14 }
 0x12f   : > { %v1516_v21 = vadd.f32 %v1515_v38, %v1472_v54 }
 0x130   : > { %1223 = vmatpush1.bf16.msra.mxu0 %v1062_v5  ;;  %v4607_v4 = vpop.permute.xlu1 %1682 }
 0x131   : > { %5571 = vst [vmem:[#allocation47_spill] sm:$0xff] %v4607_v4 }
 0x134   : > { %v4635_v60 = vpop.permute.xlu1 %1692 }
 0x135   : > { %5578 = vst [vmem:[#allocation54_spill] sm:$0xff] %v4635_v60 }
 0x138   : > { %v4667_v61 = vpop.permute.xlu1 %1702 }
 0x139   : > { %v4609_v17 = vpop.f32.mrb[8].mxu0  ;;  %5585 = vst [vmem:[#allocation61_spill] sm:$0xff] %v4667_v61 }
 0x13a   : > { %5572 = vst [vmem:[#allocation48_spill] sm:$0xff] %v4609_v17  ;;  %v1473_v29 = vmul.f32 %v4391_v41, %v4609_v17  ;;  %v4613_v30 = vpop.f32.mrb[9].mxu0 }
 0x13b   : > { %5573 = vst [vmem:[#allocation49_spill] sm:$0xff] %v4613_v30  ;;  %v1474_v7 = vmul.f32 %v4391_v41, %v4613_v30  ;;  %v4617_v57 = vpop.f32.mrb[10].mxu0 }
 0x13c   : > { %5574 = vst [vmem:[#allocation50_spill] sm:$0xff] %v4617_v57  ;;  %v1496_v1 = vadd.f32 %v1495_v34, %v1473_v29  ;;  %v1475_v14 = vmul.f32 %v4509_v46, %v4617_v57  ;;  %v4621_v23 = vpop.f32.mrb[11].mxu0  ;;  %v1064_v31 = vpack.c.bf16 %v4617_v57, %v4609_v17 }
 0x13d   : > { %5575 = vst [vmem:[#allocation51_spill] sm:$0xff] %v4621_v23  ;;  %v1517_v3 = vadd.f32 %v1516_v21, %v1474_v7  ;;  %v1476_v35 = vmul.f32 %v4509_v46, %v4621_v23  ;;  %v4627_v5 = vpop.f32.mrb[8].mxu1  ;;  %v1065_v41 = vpack.c.bf16 %v4621_v23, %v4613_v30 }
 0x13e   : > { %5576 = vst [vmem:[#allocation52_spill] sm:$0xff] %v4627_v5  ;;  %v1497_v54 = vadd.f32 %v1496_v1, %v1475_v14  ;;  %v1481_v34 = vmul.f32 %v4409_v47, %v4627_v5  ;;  %v4633_v37 = vpop.f32.mrb[9].mxu1 }
 0x13f   : > { %5577 = vst [vmem:[#allocation53_spill] sm:$0xff] %v4633_v37  ;;  %v1518_v10 = vadd.f32 %v1517_v3, %v1476_v35  ;;  %v1482_v21 = vmul.f32 %v4409_v47, %v4633_v37  ;;  %1224 = vmatprep.subr.bf16.mxu0 %v1065_v41  ;;  %v4639_v2 = vpop.f32.mrb[10].mxu1 }
 0x140   : > { %5579 = vst [vmem:[#allocation55_spill] sm:$0xff] %v4639_v2  ;;  %v1483_v46 = vmul.f32 %v4526_v63, %v4639_v2  ;;  %1225 = vmatpush1.bf16.msra.mxu0 %v1064_v31  ;;  %v4643_v38 = vpop.f32.mrb[11].mxu1  ;;  %v1068_v29 = vpack.c.bf16 %v4639_v2, %v4627_v5 }
 0x141   : > { %5580 = vst [vmem:[#allocation56_spill] sm:$0xff] %v4643_v38  ;;  %v4647_v7 = vpop.f32.mrb[12].mxu0  ;;  %v1484_v1 = vmul.f32 %v4526_v63, %v4643_v38  ;;  %v1069_v47 = vpack.c.bf16 %v4643_v38, %v4633_v37 }
 0x142   : > { %5581 = vst [vmem:[#allocation57_spill] sm:$0xff] %v4647_v7  ;;  %v1477_v14 = vmul.f32 %v4399_v43, %v4647_v7  ;;  %v4655_v3 = vpop.f32.mrb[13].mxu0 }
 0x143   : > { %5582 = vst [vmem:[#allocation58_spill] sm:$0xff] %v4655_v3  ;;  %v1478_v31 = vmul.f32 %v4399_v43, %v4655_v3  ;;  %v4659_v35 = vpop.f32.mrb[14].mxu0 }
 0x144   : > { %5583 = vst [vmem:[#allocation59_spill] sm:$0xff] %v4659_v35  ;;  %v1498_v41 = vadd.f32 %v1497_v54, %v1477_v14  ;;  %v1479_v60 = vmul.f32 %v4515_v52, %v4659_v35  ;;  %v4663_v4 = vpop.f32.mrb[15].mxu0  ;;  %v1066_v63 = vpack.c.bf16 %v4659_v35, %v4647_v7 }
 0x145   : > { %5584 = vst [vmem:[#allocation60_spill] sm:$0xff] %v4663_v4  ;;  %v1519_v19 = vadd.f32 %v1518_v10, %v1478_v31  ;;  %v1480_v16 = vmul.f32 %v4515_v52, %v4663_v4  ;;  %v4671_v55 = vpop.f32.mrb[12].mxu1  ;;  %v1067_v43 = vpack.c.bf16 %v4663_v4, %v4655_v3 }
 0x146   : > { %5586 = vst [vmem:[#allocation62_spill] sm:$0xff] %v4671_v55  ;;  %v1499_v54 = vadd.f32 %v1498_v41, %v1479_v60  ;;  %v1485_v14 = vmul.f32 %v4419_v51, %v4671_v55  ;;  %v4677_v12 = vpop.f32.mrb[13].mxu1 }
 0x147   : > { %5587 = vst [vmem:[#allocation63_spill] sm:$0xff] %v4677_v12  ;;  %v1520_v50 = vadd.f32 %v1519_v19, %v1480_v16  ;;  %v1486_v9 = vmul.f32 %v4419_v51, %v4677_v12  ;;  %1226 = vmatprep.subr.bf16.mxu0 %v1067_v43  ;;  %v4681_v10 = vpop.f32.mrb[14].mxu1  ;;  %v4693_v43 = vpop.permute.xlu1 %1712 }
 0x148   : > { %5588 = vst [vmem:[#allocation64_spill] sm:$0xff] %v4681_v10  ;;  %v1500_v31 = vadd.f32 %v1499_v54, %v1481_v34  ;;  %v1487_v52 = vmul.f32 %v4558_v13, %v4681_v10  ;;  %1227 = vmatpush1.bf16.msra.mxu0 %v1066_v63  ;;  %v4685_v61 = vpop.f32.mrb[15].mxu1  ;;  %v1070_v60 = vpack.c.bf16 %v4681_v10, %v4671_v55  ;;  %5590 = vst [vmem:[#allocation66_spill] sm:$0xff] %v4693_v43 }
 0x149   : > { %5589 = vst [vmem:[#allocation65_spill] sm:$0xff] %v4685_v61  ;;  %v1521_v41 = vadd.f32 %v1520_v50, %v1482_v21  ;;  %v1488_v16 = vmul.f32 %v4558_v13, %v4685_v61  ;;  %1228 = vmatprep.subr.bf16.mxu0 %v1069_v47  ;;  %v1071_v51 = vpack.c.bf16 %v4685_v61, %v4677_v12  ;;  %v3173_v50 = vld [vmem:[%s5398_s2] sm:$0xff]  }
 0x14a   : > { %v1501_v19 = vadd.f32 %v1500_v31, %v1483_v46 }
 0x14b   : > { %v1522_v34 = vadd.f32 %v1521_v41, %v1484_v1  ;;  %v4698_v13 = vpop.permute.xlu1 %1722  ;;  %v5592_v1 = vmov 0   ;;  %v3174_v41 = vld [vmem:[%s5398_s2 + $0x8] sm:$0xff]  }
 0x14c   : > { %v1502_v54 = vadd.f32 %v1501_v19, %v1485_v14  ;;  %1229 = vmatpush1.bf16.msra.mxu0 %v1068_v29  ;;  %5591 = vst [vmem:[#allocation67_spill] sm:$0xff] %v4698_v13 }
 0x14d   : > { %v1523_v63 = vadd.f32 %v1522_v34, %v1486_v9  ;;  %1230 = vmatprep.subr.bf16.mxu0 %v1071_v51 }
 0x14e   : > { %v1503_v44 = vadd.f32 %v1502_v54, %v1487_v52 }
 0x14f   : > { %v1524_v40 = vadd.f32 %v1523_v63, %v1488_v16  ;;  %v4701_v14 = vpop.permute.xlu1 %1942 }
 0x150   : > { %v1504_v21 = vrot.slane %v1503_v44, 4  ;;  %1231 = vmatpush1.bf16.msra.mxu0 %v1070_v60 }
 0x151   : > { %v1525_v47 = vrot.slane %v1524_v40, 4 }
 0x152   : > { %v1505_v6 = vadd.f32 %v1504_v21, %v1503_v44 }
 0x153   : > { %v1526_v46 = vadd.f32 %v1525_v47, %v1524_v40  ;;  %1249 = vmatmul.mubr.bf16.vlgmr.msra.gmra.mrb[16].mxu0 %v3173_v50 }
 0x154   : > { %v1506_v31 = vrot.slane %v1505_v6, 2  ;;  %1258 = vmatprep.mubr.bf16.mxu0 %v5592_v1 }
 0x155   : > { %v1527_v29 = vrot.slane %v1526_v46, 2 }
 0x156   : > { %v1507_v9 = vadd.f32 %v1506_v31, %v1505_v6  ;;  %v4711_v6 = vpop.permute.xlu1 %1952 }
 0x157   : > { %v1528_v52 = vadd.f32 %v1527_v29, %v1526_v46 }
 0x158   : > { %v1508_v16 = vrot.slane %v1507_v9, 1 }
 0x159   : > { %v1529_v51 = vrot.slane %v1528_v52, 1 }
 0x15a   : > { %v1509_v60 = vadd.f32 %v1508_v16, %v1507_v9 }
 0x15b   : > { %1259 = vmatmul.mubr.bf16.gmra.mrb[20].mxu0 %v3174_v41 }
 0x15c   : > { %v1545_v44 = vmul.f32 %v1509_v60, %v4591_v26  ;;  %v1547_v40 = vmul.f32 %v1509_v60, %v4609_v17  ;;  %v1549_v19 = vmul.f32 %v1509_v60, %v4617_v57  ;;  %v1551_v34 = vmul.f32 %v1509_v60, %v4647_v7  ;;  %1268 = vmatprep.mubr.bf16.mxu0 %v5592_v1 }
 0x15d   : > { %v1553_v54 = vmul.f32 %v1509_v60, %v4659_v35  ;;  %v1555_v63 = vmul.f32 %v1509_v60, %v4627_v5  ;;  %v1557_v50 = vmul.f32 %v1509_v60, %v4639_v2  ;;  %v1561_v21 = vmul.f32 %v1509_v60, %v4681_v10 }
 0x15e   : > { %v4718_v47 = vadd.f32 %v1545_v44, %v4591_v26  ;;  %v4721_v46 = vadd.f32 %v1547_v40, %v4609_v17  ;;  %v4724_v31 = vadd.f32 %v1549_v19, %v4617_v57  ;;  %v4727_v29 = vadd.f32 %v1551_v34, %v4647_v7  ;;  %v3175_v40 = vld [vmem:[%s5398_s2 + $0x10] sm:$0xff]   ;;  %v4761_v17 = vpop.permute.xlu1 %1962 }
 0x15f   : > { %v4730_v9 = vadd.f32 %v1553_v54, %v4659_v35  ;;  %v4733_v41 = vadd.f32 %v1561_v21, %v4681_v10  ;;  %v1531_v16 = vmul.f32 %v1509_v60, %v4517_v56  ;;  %v1533_v44 = vmul.f32 %v1509_v60, %v4530_v8 }
 0x160   : > { %v1535_v19 = vmul.f32 %v1509_v60, %v4560_v18  ;;  %v1537_v13 = vmul.f32 %v1509_v60, %v4571_v11  ;;  %v1539_v34 = vmul.f32 %v1509_v60, %v4541_v25  ;;  %v1541_v54 = vmul.f32 %v1509_v60, %v4551_v28 }
 0x161   : > { %v1543_v43 = vmul.f32 %v1509_v60, %v4581_v24  ;;  %v1559_v21 = vmul.f32 %v1509_v60, %v4671_v55  ;;  %v4747_v0 = vadd.f32 %v1531_v16, %v4517_v56  ;;  %v4750_v10 = vadd.f32 %v1533_v44, %v4530_v8 }
 0x162   : > { %v4753_v35 = vadd.f32 %v1535_v19, %v4560_v18  ;;  %v4756_v7 = vadd.f32 %v1537_v13, %v4571_v11  ;;  %v4759_v57 = vadd.f32 %v1539_v34, %v4541_v25  ;;  %v4764_v26 = vadd.f32 %v1541_v54, %v4551_v28  ;;  %v4797_v11 = vpop.permute.xlu1 %1972 }
 0x163   : > { %5593 = vst [vmem:[#allocation68_spill] sm:$0xff] %v4747_v0  ;;  %5594 = vst [vmem:[#allocation69_spill] sm:$0xff] %v4750_v10  ;;  %v4767_v60 = vadd.f32 %v1543_v43, %v4581_v24  ;;  %v4770_v16 = vadd.f32 %v1555_v63, %v4627_v5  ;;  %v4773_v44 = vadd.f32 %v1557_v50, %v4639_v2  ;;  %1269 = vmatmul.mubr.bf16.gmra.mrb[24].mxu0 %v3175_v40 }
 0x164   : > { %5595 = vst [vmem:[#allocation70_spill] sm:$0xff] %v4753_v35  ;;  %5596 = vst [vmem:[#allocation71_spill] sm:$0xff] %v4756_v7  ;;  %v4776_v13 = vadd.f32 %v1559_v21, %v4671_v55  ;;  %v2015_v19 = vmul.f32 %v4495_v32, %v4747_v0  ;;  %v2017_v34 = vmul.f32 %v4701_v14, %v4750_v10  ;;  %1278 = vmatprep.mubr.bf16.mxu0 %v5592_v1  ;;  %v3176_v21 = vld [vmem:[%s5398_s2 + $0x18] sm:$0xff]  }
 0x165   : > { %5597 = vst [vmem:[#allocation72_spill] sm:$0xff] %v4759_v57  ;;  %5598 = vst [vmem:[#allocation73_spill] sm:$0xff] %v4764_v26  ;;  %v1530_v54 = vadd.f32 %v1529_v51, %v1528_v52  ;;  %v2019_v43 = vmul.f32 %v4497_v33, %v4753_v35  ;;  %v2021_v63 = vmul.f32 %v4711_v6, %v4756_v7 }
 0x166   : > { %v2023_v50 = vmul.f32 %v4499_v36, %v4759_v57  ;;  %v2025_v40 = vmul.f32 %v4761_v17, %v4764_v26  ;;  %v2047_v28 = vadd.f32 %v2017_v34, %v2015_v19 }
 0x167   : > { %v1548_v52 = vmul.f32 %v1530_v54, %v4613_v30  ;;  %v1550_v51 = vmul.f32 %v1530_v54, %v4621_v23  ;;  %v1552_v25 = vmul.f32 %v1530_v54, %v4655_v3  ;;  %v1554_v18 = vmul.f32 %v1530_v54, %v4663_v4 }
 0x168   : > { %v1556_v57 = vmul.f32 %v1530_v54, %v4633_v37  ;;  %v1558_v8 = vmul.f32 %v1530_v54, %v4643_v38  ;;  %v1562_v26 = vmul.f32 %v1530_v54, %v4685_v61  ;;  %v2048_v56 = vadd.f32 %v2047_v28, %v2019_v43 }
 0x169   : > { %v4804_v55 = vadd.f32 %v1548_v52, %v4613_v30  ;;  %v4807_v19 = vadd.f32 %v1550_v51, %v4621_v23  ;;  %v4810_v34 = vadd.f32 %v1552_v25, %v4655_v3  ;;  %v4813_v2 = vadd.f32 %v1554_v18, %v4663_v4  ;;  %v1983_v3 = vpop.permute.xlu1 %1982 }
 0x16a   : > { %v4816_v7 = vadd.f32 %v1562_v26, %v4685_v61  ;;  %v1532_v35 = vmul.f32 %v1530_v54, %v4521_v59  ;;  %v1534_v10 = vmul.f32 %v1530_v54, %v4536_v15  ;;  %v2049_v28 = vadd.f32 %v2048_v56, %v2021_v63 }
 0x16b   : > { %1279 = vmatmul.mubr.bf16.gmra.mrb[28].mxu0 %v3176_v21  ;;  %v1536_v43 = vmul.f32 %v1530_v54, %v4567_v22  ;;  %v1538_v52 = vmul.f32 %v1530_v54, %v4574_v58  ;;  %v1540_v51 = vmul.f32 %v1530_v54, %v4547_v53  ;;  %v2027_v18 = vmul.f32 %v4501_v39, %v4767_v60 }
 0x16c   : > { %1288 = vmatprep.mubr.bf16.mxu0 %v5592_v1  ;;  %v1542_v25 = vmul.f32 %v1530_v54, %v4554_v20  ;;  %v1544_v26 = vmul.f32 %v1530_v54, %v4585_v27  ;;  %v1546_v61 = vmul.f32 %v1530_v54, %v4595_v62  ;;  %v2050_v4 = vadd.f32 %v2049_v28, %v2023_v50 }
 0x16d   : > { %v1560_v56 = vmul.f32 %v1530_v54, %v4677_v12  ;;  %v4831_v63 = vadd.f32 %v1532_v35, %v4521_v59  ;;  %v4834_v21 = vadd.f32 %v1534_v10, %v4536_v15  ;;  %v4837_v23 = vadd.f32 %v1536_v43, %v4567_v22  ;;  %v3177_v35 = vld [vmem:[%s5398_s2 + $0x20] sm:$0xff]  }
 0x16e   : > { %v4840_v30 = vadd.f32 %v1538_v52, %v4574_v58  ;;  %v4843_v0 = vadd.f32 %v1540_v51, %v4547_v53  ;;  %v4846_v50 = vadd.f32 %v1542_v25, %v4554_v20  ;;  %v2051_v54 = vadd.f32 %v2050_v4, %v2025_v40 }
 0x16f   : > { %v4852_v10 = vadd.f32 %v1544_v26, %v4585_v27  ;;  %v4855_v28 = vadd.f32 %v1546_v61, %v4595_v62  ;;  %v4858_v43 = vadd.f32 %v1556_v57, %v4633_v37  ;;  %v4861_v52 = vadd.f32 %v1558_v8, %v4643_v38  ;;  %v1993_v8 = vpop.permute.xlu1 %1992 }
 0x170   : > { %v4864_v51 = vadd.f32 %v1560_v56, %v4677_v12  ;;  %v2016_v25 = vmul.f32 %v4495_v32, %v4831_v63  ;;  %v2018_v4 = vmul.f32 %v4701_v14, %v4834_v21  ;;  %v2029_v40 = vmul.f32 %v4797_v11, %v4718_v47 }
 0x171   : > { %v2052_v61 = vadd.f32 %v2051_v54, %v2027_v18  ;;  %v2031_v57 = vmul.f32 %v4503_v42, %v4721_v46  ;;  %v2020_v56 = vmul.f32 %v4497_v33, %v4837_v23  ;;  %v2033_v32 = vmul.f32 %v1983_v3, %v4724_v31  ;;  %v3178_v18 = vld [vmem:[%s5398_s2 + $0x28] sm:$0xff]  }
 0x172   : > { %v2068_v27 = vadd.f32 %v2018_v4, %v2016_v25  ;;  %v2022_v14 = vmul.f32 %v4711_v6, %v4840_v30  ;;  %v2037_v25 = vmul.f32 %v1993_v8, %v4730_v9  ;;  %v2026_v6 = vmul.f32 %v4761_v17, %v4846_v50  ;;  %v3179_v17 = vld [vmem:[%s5398_s2 + $0x30] sm:$0xff]  }
 0x173   : > { %1289 = vmatmul.mubr.bf16.gmra.mrb[32].mxu0 %v3177_v35  ;;  %v2053_v26 = vadd.f32 %v2052_v61, %v2029_v40  ;;  %v2035_v35 = vmul.f32 %v4507_v45, %v4727_v29  ;;  %v2024_v40 = vmul.f32 %v4499_v36, %v4843_v0  ;;  %v2003_v61 = vpop.permute.xlu1 %2002 }
 0x174   : > { %1298 = vmatprep.mubr.bf16.mxu0 %v5592_v1  ;;  %v2069_v53 = vadd.f32 %v2068_v27, %v2020_v56 }
 0x175   : > { %v2054_v20 = vadd.f32 %v2053_v26, %v2031_v57  ;;  %v2039_v57 = vmul.f32 %v4511_v48, %v4770_v16 }
 0x176   : > { %v2070_v33 = vadd.f32 %v2069_v53, %v2022_v14  ;;  %v2041_v53 = vmul.f32 %v2003_v61, %v4773_v44 }
 0x177   : > { %v2055_v54 = vadd.f32 %v2054_v20, %v2033_v32  ;;  %v2028_v20 = vmul.f32 %v4501_v39, %v4852_v10  ;;  %v2030_v32 = vmul.f32 %v4797_v11, %v4855_v28  ;;  %v2032_v39 = vmul.f32 %v4503_v42, %v4804_v55  ;;  %v3180_v42 = vld [vmem:[%s5398_s2 + $0x38] sm:$0xff]  }
 0x178   : > { %v2071_v27 = vadd.f32 %v2070_v33, %v2024_v40 }
 0x179   : > { %v2056_v4 = vadd.f32 %v2055_v54, %v2035_v35  ;;  %v2013_v54 = vpop.permute.xlu1 %2012 }
 0x17a   : > { %v2072_v36 = vadd.f32 %v2071_v27, %v2026_v6  ;;  %v2045_v33 = vmul.f32 %v2013_v54, %v4733_v41  ;;  %v2036_v27 = vmul.f32 %v4507_v45, %v4810_v34 }
 0x17b   : > { %1299 = vmatmul.mubr.bf16.gmra.mrb[36].mxu0 %v3178_v18  ;;  %v2057_v26 = vadd.f32 %v2056_v4, %v2037_v25  ;;  %v2043_v18 = vmul.f32 %v4513_v49, %v4776_v13  ;;  %v2034_v4 = vmul.f32 %v1983_v3, %v4807_v19  ;;  %v2040_v3 = vmul.f32 %v4511_v48, %v4858_v43 }
 0x17c   : > { %1308 = vmatprep.mubr.bf16.mxu0 %v5592_v1  ;;  %v2073_v14 = vadd.f32 %v2072_v36, %v2028_v20  ;;  %v2038_v20 = vmul.f32 %v1993_v8, %v4813_v2 }
 0x17d   : > { %v2058_v56 = vadd.f32 %v2057_v26, %v2039_v57 }
 0x17e   : > { %v2074_v40 = vadd.f32 %v2073_v14, %v2030_v32  ;;  %v2042_v14 = vmul.f32 %v2003_v61, %v4861_v52 }
 0x17f   : > { %v2059_v35 = vadd.f32 %v2058_v56, %v2041_v53 }
 0x180   : > { %v2075_v11 = vadd.f32 %v2074_v40, %v2032_v39  ;;  %v2046_v39 = vmul.f32 %v2013_v54, %v4816_v7 }
 0x181   : > { %v2060_v25 = vadd.f32 %v2059_v35, %v2043_v18  ;;  %v2044_v18 = vmul.f32 %v4513_v49, %v4864_v51 }
 0x182   : > { %v2076_v57 = vadd.f32 %v2075_v11, %v2034_v4 }
 0x183   : > { %1309 = vmatmul.mubr.bf16.gmra.mrb[40].mxu0 %v3179_v17  ;;  %v2061_v6 = vadd.f32 %v2060_v25, %v2045_v33 }
 0x184   : > { %1318 = vmatprep.mubr.bf16.mxu0 %v5592_v1  ;;  %v2077_v36 = vadd.f32 %v2076_v57, %v2036_v27 }
 0x185   : > { %v2062_v26 = vrot.slane %v2061_v6, 4 }
 0x186   : > { %v2078_v56 = vadd.f32 %v2077_v36, %v2038_v20 }
 0x187   : > { %v2063_v53 = vadd.f32 %v2062_v26, %v2061_v6  ;;  %v5599_v26 = vld [vmem:[#allocation43_spill] sm:$0xff] }
 0x188   : > { %v2079_v17 = vadd.f32 %v2078_v56, %v2040_v3 }
 0x189   : > { %v2064_v32 = vrot.slane %v2063_v53, 2 }
 0x18a   : > { %v2080_v8 = vadd.f32 %v2079_v17, %v2042_v14  ;;  %v5610_v17 = vld [vmem:[#allocation68_spill] sm:$0xff] }
 0x18b   : > { %1319 = vmatmul.mubr.bf16.gmra.mrb[44].mxu0 %v3180_v42  ;;  %v2065_v45 = vadd.f32 %v2064_v32, %v2063_v53  ;;  %v5605_v42 = vld [vmem:[#allocation57_spill] sm:$0xff] }
 0x18c   : > { %v2081_v40 = vadd.f32 %v2080_v8, %v2044_v18  ;;  %v5611_v8 = vld [vmem:[#allocation69_spill] sm:$0xff] }
 0x18d   : > { %v2066_v35 = vrot.slane %v2065_v45, 1 }
 0x18e   : > { %v2082_v25 = vadd.f32 %v2081_v40, %v2046_v39  ;;  %v5612_v39 = vld [vmem:[#allocation70_spill] sm:$0xff] }
 0x18f   : > { %v2067_v33 = vadd.f32 %v2066_v35, %v2065_v45 }
 0x190   : > { %v2083_v6 = vrot.slane %v2082_v25, 4 }
 0x191   : > { %v2101_v4 = vmul.f32 %v2067_v33, %v4767_v60  ;;  %v2103_v48 = vmul.f32 %v2067_v33, %v4718_v47  ;;  %v2105_v11 = vmul.f32 %v2067_v33, %v4721_v46  ;;  %v2107_v61 = vmul.f32 %v2067_v33, %v4724_v31  ;;  %v5601_v60 = vld [vmem:[#allocation48_spill] sm:$0xff]  ;;  %v5603_v47 = vld [vmem:[#allocation50_spill] sm:$0xff] }
 0x192   : > { %v2109_v27 = vmul.f32 %v2067_v33, %v4727_v29  ;;  %v2111_v49 = vmul.f32 %v2067_v33, %v4730_v9  ;;  %v2113_v57 = vmul.f32 %v2067_v33, %v4770_v16  ;;  %v2084_v31 = vadd.f32 %v2083_v6, %v2082_v25  ;;  %v5607_v29 = vld [vmem:[#allocation59_spill] sm:$0xff] }
 0x193   : > { %v4928_v54 = vadd.f32 %v2101_v4, %v4581_v24  ;;  %v4931_v20 = vadd.f32 %v2103_v48, %v5599_v26  ;;  %v4934_v36 = vadd.f32 %v2105_v11, %v5601_v60  ;;  %v4937_v46 = vadd.f32 %v2107_v61, %v5603_v47  ;;  %v5613_v25 = vld [vmem:[#allocation71_spill] sm:$0xff]  ;;  %v5616_v61 = vld [vmem:[#allocation64_spill] sm:$0xff] }
 0x194   : > { %v4940_v53 = vadd.f32 %v2109_v27, %v5605_v42  ;;  %v4943_v9 = vadd.f32 %v2111_v49, %v5607_v29  ;;  %v4946_v16 = vadd.f32 %v2113_v57, %v4627_v5  ;;  %v2085_v3 = vrot.slane %v2084_v31, 2  ;;  %v5614_v48 = vld [vmem:[#allocation55_spill] sm:$0xff]  ;;  %v5621_v57 = vld [vmem:[#allocation33_spill] sm:$0xff]  ;;  %v5668_v42 = vld [vmem:[#allocation18_spill] sm:$0xff] }
 0x195   : > { %5600 = vst [vmem:[#allocation74_spill] sm:$0xff] %v4931_v20  ;;  %5602 = vst [vmem:[#allocation75_spill] sm:$0xff] %v4934_v36  ;;  %v2115_v56 = vmul.f32 %v2067_v33, %v4773_v44  ;;  %v2119_v32 = vmul.f32 %v2067_v33, %v4733_v41  ;;  %v2117_v14 = vmul.f32 %v2067_v33, %v4776_v13  ;;  %v5618_v44 = vld [vmem:[#allocation62_spill] sm:$0xff]  ;;  %v5620_v41 = vld [vmem:[#allocation31_spill] sm:$0xff] }
 0x196   : > { %5604 = vst [vmem:[#allocation76_spill] sm:$0xff] %v4937_v46  ;;  %5606 = vst [vmem:[#allocation77_spill] sm:$0xff] %v4940_v53  ;;  %v2089_v45 = vmul.f32 %v2067_v33, %v5610_v17  ;;  %v2086_v18 = vadd.f32 %v2085_v3, %v2084_v31  ;;  %v2091_v35 = vmul.f32 %v2067_v33, %v5611_v8  ;;  %v5622_v3 = vld [vmem:[#allocation39_spill] sm:$0xff]  ;;  %v5623_v8 = vld [vmem:[#allocation40_spill] sm:$0xff] }
 0x197   : > { %5608 = vst [vmem:[#allocation78_spill] sm:$0xff] %v4943_v9  ;;  %5609 = vst [vmem:[#allocation79_spill] sm:$0xff] %v4946_v16  ;;  %v2093_v40 = vmul.f32 %v2067_v33, %v5612_v39  ;;  %v2095_v4 = vmul.f32 %v2067_v33, %v5613_v25  ;;  %v4956_v11 = vadd.f32 %v2115_v56, %v5614_v48  ;;  %v5624_v25 = vld [vmem:[#allocation72_spill] sm:$0xff] }
 0x198   : > { %v4959_v6 = vadd.f32 %v2119_v32, %v5616_v61  ;;  %v4962_v27 = vadd.f32 %v2117_v14, %v5618_v44  ;;  %v4965_v13 = vadd.f32 %v2089_v45, %v5620_v41  ;;  %v2087_v49 = vrot.slane %v2086_v18, 1 }
 0x199   : > { %5615 = vst [vmem:[#allocation68_spill] sm:$0xff] %v4956_v11  ;;  %v4968_v31 = vadd.f32 %v2091_v35, %v5621_v57  ;;  %v4971_v17 = vadd.f32 %v2093_v40, %v5622_v3  ;;  %v4974_v39 = vadd.f32 %v2095_v4, %v5623_v8  ;;  %v2097_v32 = vmul.f32 %v2067_v33, %v5624_v25  ;;  %v5639_v11 = vld [vmem:[#allocation35_spill] sm:$0xff] }
 0x19a   : > { %5617 = vst [vmem:[#allocation69_spill] sm:$0xff] %v4959_v6  ;;  %5619 = vst [vmem:[#allocation70_spill] sm:$0xff] %v4962_v27  ;;  %v2088_v56 = vadd.f32 %v2087_v49, %v2086_v18  ;;  %v5625_v6 = vld [vmem:[#allocation73_spill] sm:$0xff] }
 0x19b   : > { %v2099_v61 = vmul.f32 %v2067_v33, %v5625_v6  ;;  %v5627_v33 = vld [vmem:[#allocation49_spill] sm:$0xff]  ;;  %v5016_v16 = vadd.f32 %v2097_v32, %v5639_v11 }
 0x19c   : > { %v2104_v14 = vmul.f32 %v2088_v56, %v4855_v28  ;;  %v2106_v45 = vmul.f32 %v2088_v56, %v4804_v55  ;;  %v2108_v41 = vmul.f32 %v2088_v56, %v4807_v19  ;;  %v2110_v35 = vmul.f32 %v2088_v56, %v4810_v34  ;;  %v5629_v28 = vld [vmem:[#allocation51_spill] sm:$0xff]  ;;  %v5631_v19 = vld [vmem:[#allocation58_spill] sm:$0xff]  ;;  %v5633_v34 = vld [vmem:[#allocation60_spill] sm:$0xff] }
 0x19d   : > { %v2112_v27 = vmul.f32 %v2088_v56, %v4813_v2  ;;  %v2114_v40 = vmul.f32 %v2088_v56, %v4858_v43  ;;  %v2116_v4 = vmul.f32 %v2088_v56, %v4861_v52  ;;  %v2120_v18 = vmul.f32 %v2088_v56, %v4816_v7  ;;  %v5637_v52 = vld [vmem:[#allocation65_spill] sm:$0xff] }
 0x19e   : > { %v4987_v49 = vadd.f32 %v2104_v14, %v4595_v62  ;;  %v4990_v6 = vadd.f32 %v2106_v45, %v5627_v33  ;;  %v4993_v55 = vadd.f32 %v2108_v41, %v5629_v28  ;;  %v4996_v25 = vadd.f32 %v2110_v35, %v5631_v19  ;;  %v5671_v33 = vld [vmem:[#allocation42_spill] sm:$0xff] }
 0x19f   : > { %v4999_v2 = vadd.f32 %v2112_v27, %v5633_v34  ;;  %v5002_v43 = vadd.f32 %v2114_v40, %v4633_v37  ;;  %v5005_v7 = vadd.f32 %v2116_v4, %v4643_v38  ;;  %v5008_v14 = vadd.f32 %v2120_v18, %v5637_v52  ;;  %v5640_v4 = vld [vmem:[#allocation37_spill] sm:$0xff] }
 0x1a0   : > { %5626 = vst [vmem:[#allocation71_spill] sm:$0xff] %v4987_v49  ;;  %5628 = vst [vmem:[#allocation31_spill] sm:$0xff] %v4990_v6  ;;  %v2118_v45 = vmul.f32 %v2088_v56, %v4864_v51  ;;  %v2090_v41 = vmul.f32 %v2088_v56, %v4831_v63  ;;  %v2092_v44 = vmul.f32 %v2088_v56, %v4834_v21  ;;  %v5642_v21 = vld [vmem:[#allocation36_spill] sm:$0xff] }
 0x1a1   : > { %5630 = vst [vmem:[#allocation33_spill] sm:$0xff] %v4993_v55  ;;  %5632 = vst [vmem:[#allocation39_spill] sm:$0xff] %v4996_v25  ;;  %v2094_v35 = vmul.f32 %v2088_v56, %v4837_v23  ;;  %v2096_v27 = vmul.f32 %v2088_v56, %v4840_v30  ;;  %v2098_v40 = vmul.f32 %v2088_v56, %v4843_v0 }
 0x1a2   : > { %5634 = vst [vmem:[#allocation40_spill] sm:$0xff] %v4999_v2  ;;  %5635 = vst [vmem:[#allocation72_spill] sm:$0xff] %v5002_v43  ;;  %v5023_v18 = vadd.f32 %v2118_v45, %v4677_v12  ;;  %v5026_v51 = vadd.f32 %v2090_v41, %v4521_v59  ;;  %v5029_v63 = vadd.f32 %v2092_v44, %v4536_v15  ;;  %v5643_v45 = vld [vmem:[#allocation38_spill] sm:$0xff]  ;;  %v5644_v59 = vld [vmem:[#allocation41_spill] sm:$0xff] }
 0x1a3   : > { %5636 = vst [vmem:[#allocation73_spill] sm:$0xff] %v5005_v7  ;;  %5638 = vst [vmem:[#allocation80_spill] sm:$0xff] %v5008_v14  ;;  %v5020_v7 = vadd.f32 %v2099_v61, %v5640_v4  ;;  %v5032_v23 = vadd.f32 %v2094_v35, %v4567_v22  ;;  %v5035_v30 = vadd.f32 %v2096_v27, %v4574_v58  ;;  %v5647_v43 = vld [vmem:[#allocation8_spill] sm:$0xff]  ;;  %v5648_v2 = vld [vmem:[#allocation15_spill] sm:$0xff] }
 0x1a4   : > { %5641 = vst [vmem:[#allocation35_spill] sm:$0xff] %v5023_v18  ;;  %v5038_v0 = vadd.f32 %v2098_v40, %v5642_v21  ;;  %v2100_v61 = vmul.f32 %v2088_v56, %v4846_v50  ;;  %v2102_v32 = vmul.f32 %v2088_v56, %v4852_v10  ;;  %v5646_v18 = vld [vmem:[#allocation7_spill] sm:$0xff] }
 0x1a6   : > { %v5043_v14 = vadd.f32 %v2100_v61, %v5643_v45  ;;  %v5046_v41 = vadd.f32 %v2102_v32, %v5644_v59 }
 0x1a8   : > { %5645 = vst [vmem:[#allocation37_spill] sm:$0xff] %v5046_v41 }
 0x226   : > { %v1250_v44 = vpop.f32.mrb[16].mxu0 }
 0x227   : > { %v1251_v35 = vadd.f32 %v1250_v44, %v5646_v18  ;;  %v1252_v52 = vpop.f32.mrb[17].mxu0 }
 0x228   : > { %v1253_v27 = vadd.f32 %v1252_v52, %v5646_v18  ;;  %v1254_v12 = vpop.f32.mrb[18].mxu0  ;;  %v5649_v52 = vld [vmem:[#allocation16_spill] sm:$0xff] }
 0x229   : > { %v1255_v40 = vadd.f32 %v1254_v12, %v5647_v43  ;;  %v1256_v38 = vpop.f32.mrb[19].mxu0  ;;  %v1329_v48 = vmax.f32 %v1251_v35, 0.0 }
 0x22a   : > { %v1257_v50 = vadd.f32 %v1256_v38, %v5647_v43  ;;  %v1330_v56 = vmax.f32 %v1253_v27, 0.0 }
 0x22b   : > { %v1331_v10 = vmax.f32 %v1255_v40, 0.0 }
 0x22c   : > { %v1332_v61 = vmax.f32 %v1257_v50, 0.0 }
 0x22d   : > { %v1612_v37 = vpack.c.bf16 %v1331_v10, %v1329_v48 }
 0x22e   : > { %v1613_v5 = vpack.c.bf16 %v1332_v61, %v1330_v56  ;;  %v1260_v32 = vpop.f32.mrb[20].mxu0  ;;  %v5650_v56 = vld [vmem:[#allocation9_spill] sm:$0xff] }
 0x22f   : > { %v1261_v9 = vadd.f32 %v1260_v32, %v5648_v2  ;;  %v1262_v25 = vpop.f32.mrb[21].mxu0 }
 0x230   : > { %v1263_v44 = vadd.f32 %v1262_v25, %v5648_v2  ;;  %v1264_v34 = vpop.f32.mrb[22].mxu0  ;;  %1773 = vmatprep.subr.bf16.mxu1 %v1613_v5  ;;  %v5651_v5 = vld [vmem:[#allocation17_spill] sm:$0xff] }
 0x231   : > { %v1265_v18 = vadd.f32 %v1264_v34, %v5649_v52  ;;  %v1266_v12 = vpop.f32.mrb[23].mxu0  ;;  %1774 = vmatpush1.bf16.msra.mxu1 %v1612_v37  ;;  %v1333_v43 = vmax.f32 %v1261_v9, 0.0 }
 0x232   : > { %v1267_v38 = vadd.f32 %v1266_v12, %v5649_v52  ;;  %v1334_v27 = vmax.f32 %v1263_v44, 0.0 }
 0x233   : > { %v1335_v35 = vmax.f32 %v1265_v18, 0.0 }
 0x234   : > { %v1336_v40 = vmax.f32 %v1267_v38, 0.0 }
 0x235   : > { %v1614_v48 = vpack.c.bf16 %v1335_v35, %v1333_v43  ;;  %v5652_v35 = vld [vmem:[#allocation10_spill] sm:$0xff] }
 0x236   : > { %v1615_v50 = vpack.c.bf16 %v1336_v40, %v1334_v27  ;;  %v1270_v10 = vpop.f32.mrb[24].mxu0 }
 0x237   : > { %v1271_v61 = vadd.f32 %v1270_v10, %v5650_v56  ;;  %v1272_v32 = vpop.f32.mrb[25].mxu0 }
 0x238   : > { %v1273_v25 = vadd.f32 %v1272_v32, %v5650_v56  ;;  %v1274_v2 = vpop.f32.mrb[26].mxu0  ;;  %1775 = vmatprep.subr.bf16.mxu1 %v1615_v50  ;;  %v5653_v50 = vld [vmem:[#allocation19_spill] sm:$0xff] }
 0x239   : > { %v1275_v34 = vadd.f32 %v1274_v2, %v5651_v5  ;;  %v1276_v53 = vpop.f32.mrb[27].mxu0  ;;  %1776 = vmatpush1.bf16.msra.mxu1 %v1614_v48  ;;  %v1337_v9 = vmax.f32 %v1271_v61, 0.0 }
 0x23a   : > { %v1277_v37 = vadd.f32 %v1276_v53, %v5651_v5  ;;  %v1338_v44 = vmax.f32 %v1273_v25, 0.0 }
 0x23b   : > { %v1339_v52 = vmax.f32 %v1275_v34, 0.0 }
 0x23c   : > { %v1340_v18 = vmax.f32 %v1277_v37, 0.0 }
 0x23d   : > { %v1616_v12 = vpack.c.bf16 %v1339_v52, %v1337_v9  ;;  %v5654_v52 = vld [vmem:[#allocation11_spill] sm:$0xff] }
 0x23e   : > { %v1617_v38 = vpack.c.bf16 %v1340_v18, %v1338_v44  ;;  %v1280_v43 = vpop.f32.mrb[28].mxu0 }
 0x23f   : > { %v1281_v27 = vadd.f32 %v1280_v43, %v5652_v35  ;;  %v1282_v40 = vpop.f32.mrb[29].mxu0 }
 0x240   : > { %v1283_v10 = vadd.f32 %v1282_v40, %v5652_v35  ;;  %v1284_v56 = vpop.f32.mrb[30].mxu0  ;;  %1777 = vmatprep.subr.bf16.mxu1 %v1617_v38  ;;  %v5655_v38 = vld [vmem:[#allocation21_spill] sm:$0xff] }
 0x241   : > { %v1285_v32 = vadd.f32 %v1284_v56, %v5653_v50  ;;  %v1286_v2 = vpop.f32.mrb[31].mxu0  ;;  %1778 = vmatpush1.bf16.msra.mxu1 %v1616_v12  ;;  %v1341_v48 = vmax.f32 %v1281_v27, 0.0 }
 0x242   : > { %v1287_v53 = vadd.f32 %v1286_v2, %v5653_v50  ;;  %v1342_v25 = vmax.f32 %v1283_v10, 0.0 }
 0x243   : > { %v1343_v61 = vmax.f32 %v1285_v32, 0.0 }
 0x244   : > { %v1344_v5 = vmax.f32 %v1287_v53, 0.0 }
 0x245   : > { %v1618_v34 = vpack.c.bf16 %v1343_v61, %v1341_v48  ;;  %v5656_v61 = vld [vmem:[#allocation12_spill] sm:$0xff] }
 0x246   : > { %v1619_v37 = vpack.c.bf16 %v1344_v5, %v1342_v25  ;;  %v1290_v9 = vpop.f32.mrb[32].mxu0 }
 0x247   : > { %v1291_v44 = vadd.f32 %v1290_v9, %v5654_v52  ;;  %v1292_v18 = vpop.f32.mrb[33].mxu0 }
 0x248   : > { %v1293_v43 = vadd.f32 %v1292_v18, %v5654_v52  ;;  %v1294_v35 = vpop.f32.mrb[34].mxu0  ;;  %1779 = vmatprep.subr.bf16.mxu1 %v1619_v37  ;;  %v5657_v37 = vld [vmem:[#allocation24_spill] sm:$0xff] }
 0x249   : > { %v1295_v40 = vadd.f32 %v1294_v35, %v5655_v38  ;;  %v1296_v56 = vpop.f32.mrb[35].mxu0  ;;  %1780 = vmatpush1.bf16.msra.mxu1 %v1618_v34  ;;  %v1345_v27 = vmax.f32 %v1291_v44, 0.0 }
 0x24a   : > { %v1297_v12 = vadd.f32 %v1296_v56, %v5655_v38  ;;  %v1346_v10 = vmax.f32 %v1293_v43, 0.0 }
 0x24b   : > { %v1347_v50 = vmax.f32 %v1295_v40, 0.0 }
 0x24c   : > { %v1348_v32 = vmax.f32 %v1297_v12, 0.0 }
 0x24d   : > { %v1620_v2 = vpack.c.bf16 %v1347_v50, %v1345_v27  ;;  %v5658_v50 = vld [vmem:[#allocation13_spill] sm:$0xff] }
 0x24e   : > { %v1621_v53 = vpack.c.bf16 %v1348_v32, %v1346_v10  ;;  %v1300_v48 = vpop.f32.mrb[36].mxu0 }
 0x24f   : > { %v1301_v25 = vadd.f32 %v1300_v48, %v5656_v61  ;;  %v1302_v5 = vpop.f32.mrb[37].mxu0 }
 0x250   : > { %v1303_v9 = vadd.f32 %v1302_v5, %v5656_v61  ;;  %v1304_v52 = vpop.f32.mrb[38].mxu0  ;;  %1781 = vmatprep.subr.bf16.mxu1 %v1621_v53  ;;  %v5659_v53 = vld [vmem:[#allocation26_spill] sm:$0xff] }
 0x251   : > { %v1305_v18 = vadd.f32 %v1304_v52, %v5657_v37  ;;  %v1306_v35 = vpop.f32.mrb[39].mxu0  ;;  %1782 = vmatpush1.bf16.msra.mxu1 %v1620_v2  ;;  %v1349_v44 = vmax.f32 %v1301_v25, 0.0 }
 0x252   : > { %v1307_v34 = vadd.f32 %v1306_v35, %v5657_v37  ;;  %v1350_v43 = vmax.f32 %v1303_v9, 0.0 }
 0x253   : > { %v1351_v38 = vmax.f32 %v1305_v18, 0.0 }
 0x254   : > { %v1352_v40 = vmax.f32 %v1307_v34, 0.0 }
 0x255   : > { %v1622_v56 = vpack.c.bf16 %v1351_v38, %v1349_v44  ;;  %v5660_v38 = vld [vmem:[#allocation14_spill] sm:$0xff] }
 0x256   : > { %v1623_v12 = vpack.c.bf16 %v1352_v40, %v1350_v43  ;;  %v1310_v27 = vpop.f32.mrb[40].mxu0 }
 0x257   : > { %v1311_v10 = vadd.f32 %v1310_v27, %v5658_v50  ;;  %v1312_v32 = vpop.f32.mrb[41].mxu0 }
 0x258   : > { %v1313_v48 = vadd.f32 %v1312_v32, %v5658_v50  ;;  %v1314_v61 = vpop.f32.mrb[42].mxu0  ;;  %1783 = vmatprep.subr.bf16.mxu1 %v1623_v12  ;;  %v5661_v12 = vld [vmem:[#allocation29_spill] sm:$0xff] }
 0x259   : > { %v1315_v5 = vadd.f32 %v1314_v61, %v5659_v53  ;;  %v1316_v52 = vpop.f32.mrb[43].mxu0  ;;  %1784 = vmatpush1.bf16.msra.mxu1 %v1622_v56  ;;  %v1353_v25 = vmax.f32 %v1311_v10, 0.0 }
 0x25a   : > { %v1317_v2 = vadd.f32 %v1316_v52, %v5659_v53  ;;  %v1354_v9 = vmax.f32 %v1313_v48, 0.0 }
 0x25b   : > { %v1355_v37 = vmax.f32 %v1315_v5, 0.0 }
 0x25c   : > { %v1356_v18 = vmax.f32 %v1317_v2, 0.0 }
 0x25d   : > { %v1624_v35 = vpack.c.bf16 %v1355_v37, %v1353_v25  ;;  %v3181_v25 = vld [vmem:[%s5398_s2 + $0x40] sm:$0xff]   ;;  %v3182_v37 = vld [vmem:[%s5398_s2 + $0x48] sm:$0xff]  }
 0x25e   : > { %v1625_v34 = vpack.c.bf16 %v1356_v18, %v1354_v9  ;;  %v1320_v44 = vpop.f32.mrb[44].mxu0  ;;  %v3183_v9 = vld [vmem:[%s5398_s2 + $0x50] sm:$0xff]   ;;  %v3184_v18 = vld [vmem:[%s5398_s2 + $0x58] sm:$0xff]  }
 0x25f   : > { %v1321_v43 = vadd.f32 %v1320_v44, %v5660_v38  ;;  %v1322_v40 = vpop.f32.mrb[45].mxu0  ;;  %v3187_v44 = vld [vmem:[%s5398_s2 + $0x70] sm:$0xff]  }
 0x260   : > { %v1323_v27 = vadd.f32 %v1322_v40, %v5660_v38  ;;  %v1324_v50 = vpop.f32.mrb[46].mxu0  ;;  %1785 = vmatprep.subr.bf16.mxu1 %v1625_v34  ;;  %v3186_v34 = vld [vmem:[%s5398_s2 + $0x68] sm:$0xff]   ;;  %v3188_v38 = vld [vmem:[%s5398_s2 + $0x78] sm:$0xff]   ;;  %v5111_v40 = vpop.permute.xlu0 %2181 }
 0x261   : > { %v1325_v32 = vadd.f32 %v1324_v50, %v5661_v12  ;;  %v1326_v61 = vpop.f32.mrb[47].mxu0  ;;  %1786 = vmatpush1.bf16.msra.mxu1 %v1624_v35  ;;  %v1357_v10 = vmax.f32 %v1321_v43, 0.0  ;;  %v3185_v35 = vld [vmem:[%s5398_s2 + $0x60] sm:$0xff]   ;;  %v2177_v43 = vpop.permute.xlu1 %2176 }
 0x262   : > { %v1327_v56 = vadd.f32 %v1326_v61, %v5661_v12  ;;  %v1358_v48 = vmax.f32 %v1323_v27, 0.0 }
 0x263   : > { %v1359_v53 = vmax.f32 %v1325_v32, 0.0 }
 0x264   : > { %v1360_v5 = vmax.f32 %v1327_v56, 0.0  ;;  %v5115_v50 = vpop.permute.xlu0 %2191 }
 0x265   : > { %v1626_v52 = vpack.c.bf16 %v1359_v53, %v1357_v10  ;;  %v5113_v27 = vpop.permute.xlu1 %2186 }
 0x266   : > { %v1627_v2 = vpack.c.bf16 %v1360_v5, %v1358_v48 }
 0x268   : > { %1787 = vmatprep.subr.bf16.mxu1 %v1627_v2  ;;  %v5119_v32 = vpop.permute.xlu0 %2201 }
 0x269   : > { %1788 = vmatpush1.bf16.msra.mxu1 %v1626_v52  ;;  %v5117_v12 = vpop.permute.xlu1 %2196 }
 0x26c   : > { %1806 = vmatmul.mubr.bf16.vlgmr.msra.gmra.mrb[16].mxu1 %v3181_v25  ;;  %v5123_v56 = vpop.permute.xlu0 %2211 }
 0x26d   : > { %1815 = vmatprep.mubr.bf16.mxu1 %v5592_v1  ;;  %v5121_v61 = vpop.permute.xlu1 %2206  ;;  %5663 = vst [vmem:[#allocation38_spill] sm:$0xff] %v5123_v56 }
 0x26e   : > { %5662 = vst [vmem:[#allocation36_spill] sm:$0xff] %v5121_v61 }
 0x270   : > { %v5127_v10 = vpop.permute.xlu0 %2221 }
 0x271   : > { %5665 = vst [vmem:[#allocation7_spill] sm:$0xff] %v5127_v10 }
 0x274   : > { %1816 = vmatmul.mubr.bf16.gmra.mrb[20].mxu1 %v3182_v37  ;;  %v2306_v48 = vpop.permute.xlu0 %2305 }
 0x275   : > { %1825 = vmatprep.mubr.bf16.mxu1 %v5592_v1 }
 0x278   : > { %v2462_v52 = vpop.permute.xlu0 %2461 }
 0x27c   : > { %1826 = vmatmul.mubr.bf16.gmra.mrb[24].mxu1 %v3183_v9  ;;  %v5131_v25 = vpop.permute.xlu0 %2315 }
 0x27d   : > { %1835 = vmatprep.mubr.bf16.mxu1 %v5592_v1 }
 0x280   : > { %v5135_v9 = vpop.permute.xlu0 %2320 }
 0x284   : > { %1836 = vmatmul.mubr.bf16.gmra.mrb[28].mxu1 %v3184_v18 }
 0x285   : > { %1845 = vmatprep.mubr.bf16.mxu1 %v5592_v1 }
 0x28c   : > { %1846 = vmatmul.mubr.bf16.gmra.mrb[32].mxu1 %v3185_v35  ;;  %v5139_v35 = vpop.permute.xlu0 %2325 }
 0x28d   : > { %1855 = vmatprep.mubr.bf16.mxu1 %v5592_v1 }
 0x294   : > { %1856 = vmatmul.mubr.bf16.gmra.mrb[36].mxu1 %v3186_v34 }
 0x295   : > { %1865 = vmatprep.mubr.bf16.mxu1 %v5592_v1 }
 0x29c   : > { %1866 = vmatmul.mubr.bf16.gmra.mrb[40].mxu1 %v3187_v44  ;;  %v5143_v44 = vpop.permute.xlu0 %2330 }
 0x29d   : > { %1875 = vmatprep.mubr.bf16.mxu1 %v5592_v1  ;;  %v5125_v1 = vpop.permute.xlu1 %2216 }
 0x29e   : > { %5664 = vst [vmem:[#allocation41_spill] sm:$0xff] %v5125_v1 }
 0x2a0   : > { %v5147_v29 = vpop.permute.xlu0 %2335 }
 0x2a1   : > { %v2301_v53 = vpop.permute.xlu1 %2300  ;;  %5666 = vst [vmem:[#allocation8_spill] sm:$0xff] %v5147_v29 }
 0x2a4   : > { %1876 = vmatmul.mubr.bf16.gmra.mrb[44].mxu1 %v3188_v38  ;;  %v5152_v28 = vpop.permute.xlu0 %2340 }
 0x2a5   : > { %v5129_v5 = vpop.permute.xlu1 %2310  ;;  %5669 = vst [vmem:[#allocation16_spill] sm:$0xff] %v5152_v28  ;;  %v2539_v28 = vmul.f32 %v2462_v52, %v4965_v13  ;;  %v5674_v13 = vld [vmem:[#allocation20_spill] sm:$0xff] }
 0x2a9   : > { %v2467_v2 = vpop.permute.xlu1 %2466 }
 0x2ad   : > { %v5133_v37 = vpop.permute.xlu1 %2471 }
 0x2b1   : > { %v5137_v18 = vpop.permute.xlu1 %2476 }
 0x2b5   : > { %v5141_v34 = vpop.permute.xlu1 %2481 }
 0x2b9   : > { %v5145_v38 = vpop.permute.xlu1 %2486 }
 0x2bd   : > { %v5149_v19 = vpop.permute.xlu1 %2491 }
 0x2be   : > { %5667 = vst [vmem:[#allocation15_spill] sm:$0xff] %v5149_v19  ;;  %v5162_v19 = vpop.permute.xlu0 %2345 }
 0x2c1   : > { %v5155_v47 = vpop.permute.xlu1 %2496 }
 0x2c2   : > { %5670 = vst [vmem:[#allocation9_spill] sm:$0xff] %v5155_v47 }
 0x33f   : > { %v1807_v10 = vpop.f32.mrb[16].mxu1 }
 0x340   : > { %v1808_v55 = vadd.f32 %v1807_v10, %v5668_v42  ;;  %v1809_v46 = vpop.f32.mrb[17].mxu1  ;;  %v5672_v10 = vld [vmem:[#allocation32_spill] sm:$0xff] }
 0x341   : > { %v1810_v6 = vadd.f32 %v1809_v46, %v5668_v42  ;;  %v1811_v1 = vpop.f32.mrb[18].mxu1  ;;  %v2251_v46 = vmul.f32 %v2177_v43, %v5621_v57 }
 0x342   : > { %v1886_v36 = vmax.f32 %v1808_v55, 0.0  ;;  %v1812_v56 = vadd.f32 %v1811_v1, %v5671_v33  ;;  %v1813_v60 = vpop.f32.mrb[19].mxu1  ;;  %v5673_v55 = vld [vmem:[#allocation34_spill] sm:$0xff]  ;;  %v2540_v1 = vmul.f32 %v2462_v52, %v5026_v51 }
 0x343   : > { %v1887_v49 = vmax.f32 %v1810_v6, 0.0  ;;  %v1814_v20 = vadd.f32 %v1813_v60, %v5671_v33  ;;  %v2252_v6 = vmul.f32 %v2177_v43, %v4536_v15  ;;  %v5167_v33 = vpop.permute.xlu1 %2501  ;;  %v5675_v43 = vld [vmem:[#allocation45_spill] sm:$0xff] }
 0x344   : > { %v2378_v62 = vmul.f32 %v2301_v53, %v1886_v36  ;;  %v1888_v41 = vmax.f32 %v1812_v56, 0.0 }
 0x345   : > { %v2379_v29 = vmul.f32 %v2301_v53, %v1887_v49  ;;  %v1889_v61 = vmax.f32 %v1814_v20, 0.0 }
 0x346   : > { %v2410_v26 = vadd.f32 %v2378_v62, %v5672_v10  ;;  %v2380_v42 = vmul.f32 %v2306_v48, %v1888_v41  ;;  %v2541_v62 = vmul.f32 %v2467_v2, %v4968_v31  ;;  %v2542_v10 = vmul.f32 %v2467_v2, %v5029_v63  ;;  %v5178_v63 = vpop.permute.xlu0 %2350 }
 0x347   : > { %v2411_v47 = vadd.f32 %v2379_v29, %v5673_v55  ;;  %v2381_v60 = vmul.f32 %v2306_v48, %v1889_v61  ;;  %v1817_v36 = vpop.f32.mrb[20].mxu1 }
 0x348   : > { %v2571_v20 = vadd.f32 %v2539_v28, %v2410_v26  ;;  %v2412_v49 = vadd.f32 %v2380_v42, %v2251_v46  ;;  %v1818_v56 = vadd.f32 %v1817_v36, %v5674_v13  ;;  %v1819_v57 = vpop.f32.mrb[21].mxu1  ;;  %v2253_v46 = vmul.f32 %v5111_v40, %v5622_v3  ;;  %v5183_v36 = vpop.permute.xlu1 %2506 }
 0x349   : > { %v2572_v41 = vadd.f32 %v2540_v1, %v2411_v47  ;;  %v2413_v53 = vadd.f32 %v2381_v60, %v2252_v6  ;;  %v1820_v29 = vadd.f32 %v1819_v57, %v5674_v13  ;;  %v1821_v51 = vpop.f32.mrb[22].mxu1  ;;  %v2254_v1 = vmul.f32 %v5111_v40, %v4567_v22 }
 0x34a   : > { %v2573_v52 = vadd.f32 %v2541_v62, %v2412_v49  ;;  %v1890_v15 = vmax.f32 %v1818_v56, 0.0  ;;  %v1822_v61 = vadd.f32 %v1821_v51, %v5675_v43  ;;  %v1823_v48 = vpop.f32.mrb[23].mxu1  ;;  %v2255_v3 = vmul.f32 %v5113_v27, %v5623_v8 }
 0x34b   : > { %v2574_v55 = vadd.f32 %v2542_v10, %v2413_v53  ;;  %v1891_v26 = vmax.f32 %v1820_v29, 0.0  ;;  %v1824_v28 = vadd.f32 %v1823_v48, %v5675_v43  ;;  %v2544_v56 = vmul.f32 %v5133_v37, %v5032_v23  ;;  %v5676_v53 = vld [vmem:[#allocation22_spill] sm:$0xff]  ;;  %v5202_v48 = vpop.permute.xlu0 %2226 }
 0x34c   : > { %v2603_v31 = vadd.f32 %v2573_v52, %v2571_v20  ;;  %v2382_v47 = vmul.f32 %v5129_v5, %v1890_v15  ;;  %v1892_v42 = vmax.f32 %v1822_v61, 0.0  ;;  %v2543_v20 = vmul.f32 %v5133_v37, %v4971_v17  ;;  %v5677_v15 = vld [vmem:[#allocation46_spill] sm:$0xff] }
 0x34d   : > { %v2624_v2 = vadd.f32 %v2574_v55, %v2572_v41  ;;  %v2383_v6 = vmul.f32 %v5129_v5, %v1891_v26  ;;  %v1893_v60 = vmax.f32 %v1824_v28, 0.0  ;;  %v2256_v22 = vmul.f32 %v5113_v27, %v4574_v58 }
 0x34e   : > { %v2414_v49 = vadd.f32 %v2382_v47, %v2253_v46  ;;  %v2384_v62 = vmul.f32 %v5131_v25, %v1892_v42  ;;  %v2545_v17 = vmul.f32 %v5137_v18, %v4974_v39  ;;  %v2546_v52 = vmul.f32 %v5137_v18, %v5035_v30  ;;  %v5207_v30 = vpop.permute.xlu1 %2355 }
 0x34f   : > { %v2415_v13 = vadd.f32 %v2383_v6, %v2254_v1  ;;  %v2385_v40 = vmul.f32 %v5131_v25, %v1893_v60  ;;  %v1827_v5 = vpop.f32.mrb[24].mxu1  ;;  %v2257_v46 = vmul.f32 %v5115_v50, %v5639_v11  ;;  %v2258_v42 = vmul.f32 %v5115_v50, %v5642_v21 }
 0x350   : > { %v2575_v57 = vadd.f32 %v2543_v20, %v2414_v49  ;;  %v2416_v41 = vadd.f32 %v2384_v62, %v2255_v3  ;;  %v1828_v10 = vadd.f32 %v1827_v5, %v5676_v53  ;;  %v1829_v8 = vpop.f32.mrb[25].mxu1  ;;  %v2547_v49 = vmul.f32 %v5141_v34, %v5016_v16  ;;  %v5226_v5 = vpop.permute.xlu0 %2511 }
 0x351   : > { %v2576_v29 = vadd.f32 %v2544_v56, %v2415_v13  ;;  %v2417_v51 = vadd.f32 %v2385_v40, %v2256_v22  ;;  %v1830_v23 = vadd.f32 %v1829_v8, %v5676_v53  ;;  %v1831_v37 = vpop.f32.mrb[26].mxu1  ;;  %v2259_v11 = vmul.f32 %v5117_v12, %v5640_v4  ;;  %v5678_v22 = vld [vmem:[#allocation23_spill] sm:$0xff] }
 0x352   : > { %v2604_v58 = vadd.f32 %v2603_v31, %v2575_v57  ;;  %v2577_v27 = vadd.f32 %v2545_v17, %v2416_v41  ;;  %v1894_v25 = vmax.f32 %v1828_v10, 0.0  ;;  %v1832_v43 = vadd.f32 %v1831_v37, %v5677_v15  ;;  %v1833_v61 = vpop.f32.mrb[27].mxu1  ;;  %v5679_v10 = vld [vmem:[#allocation47_spill] sm:$0xff] }
 0x353   : > { %v2625_v39 = vadd.f32 %v2624_v2, %v2576_v29  ;;  %v2578_v55 = vadd.f32 %v2546_v52, %v2417_v51  ;;  %v1895_v26 = vmax.f32 %v1830_v23, 0.0  ;;  %v1834_v28 = vadd.f32 %v1833_v61, %v5677_v15  ;;  %v5680_v61 = vld [vmem:[#allocation15_spill] sm:$0xff] }
 0x354   : > { %v2605_v18 = vadd.f32 %v2604_v58, %v2577_v27  ;;  %v2386_v31 = vmul.f32 %v5135_v9, %v1894_v25  ;;  %v1896_v47 = vmax.f32 %v1832_v43, 0.0  ;;  %v2548_v62 = vmul.f32 %v5141_v34, %v5038_v0 }
 0x355   : > { %v2626_v1 = vadd.f32 %v2625_v39, %v2578_v55  ;;  %v2387_v6 = vmul.f32 %v5135_v9, %v1895_v26  ;;  %v1897_v2 = vmax.f32 %v1834_v28, 0.0  ;;  %v2260_v21 = vmul.f32 %v5117_v12, %v5643_v45  ;;  %v5681_v26 = vld [vmem:[#allocation43_spill] sm:$0xff]  ;;  %v5682_v28 = vld [vmem:[#allocation36_spill] sm:$0xff] }
 0x356   : > { %v2418_v60 = vadd.f32 %v2386_v31, %v2257_v46  ;;  %v2388_v20 = vmul.f32 %v5139_v35, %v1896_v47  ;;  %v2549_v16 = vmul.f32 %v5145_v38, %v5020_v7  ;;  %v2550_v0 = vmul.f32 %v5145_v38, %v5043_v14 }
 0x357   : > { %v2419_v3 = vadd.f32 %v2387_v6, %v2258_v42  ;;  %v2389_v50 = vmul.f32 %v5139_v35, %v1897_v2  ;;  %v1837_v9 = vpop.f32.mrb[28].mxu1  ;;  %v5231_v35 = vpop.permute.xlu1 %2231  ;;  %v2261_v14 = vmul.f32 %v5119_v32, %v4581_v24  ;;  %v2262_v25 = vmul.f32 %v5119_v32, %v5644_v59  ;;  %v5684_v42 = vld [vmem:[#allocation37_spill] sm:$0xff]  ;;  %v5685_v6 = vld [vmem:[#allocation44_spill] sm:$0xff]  ;;  %v5686_v2 = vld [vmem:[#allocation74_spill] sm:$0xff] }
 0x358   : > { %v2579_v13 = vadd.f32 %v2547_v49, %v2418_v60  ;;  %v2420_v56 = vadd.f32 %v2388_v20, %v2259_v11  ;;  %v1838_v40 = vadd.f32 %v1837_v9, %v5678_v22  ;;  %v1839_v4 = vpop.f32.mrb[29].mxu1  ;;  %v2551_v39 = vmul.f32 %v5680_v61, %v4928_v54  ;;  %v5246_v24 = vpop.permute.xlu0 %2360  ;;  %v5687_v54 = vld [vmem:[#allocation9_spill] sm:$0xff] }
 0x359   : > { %v2580_v57 = vadd.f32 %v2548_v62, %v2419_v3  ;;  %v2421_v41 = vadd.f32 %v2389_v50, %v2260_v21  ;;  %v1840_v45 = vadd.f32 %v1839_v4, %v5678_v22  ;;  %v1841_v12 = vpop.f32.mrb[30].mxu1  ;;  %v2263_v46 = vmul.f32 %v5682_v28, %v5681_v26  ;;  %v5688_v3 = vld [vmem:[#allocation25_spill] sm:$0xff]  ;;  %v5689_v50 = vld [vmem:[#allocation71_spill] sm:$0xff] }
 0x35a   : > { %v2606_v34 = vadd.f32 %v2605_v18, %v2579_v13  ;;  %v2581_v17 = vadd.f32 %v2549_v16, %v2420_v56  ;;  %v1898_v53 = vmax.f32 %v1838_v40, 0.0  ;;  %v1842_v7 = vadd.f32 %v1841_v12, %v5679_v10  ;;  %v1843_v8 = vpop.f32.mrb[31].mxu1  ;;  %v5683_v18 = vld [vmem:[#allocation8_spill] sm:$0xff]  ;;  %v5697_v26 = vld [vmem:[#allocation41_spill] sm:$0xff] }
 0x35b   : > { %v2627_v29 = vadd.f32 %v2626_v1, %v2580_v57  ;;  %v2582_v51 = vadd.f32 %v2550_v0, %v2421_v41  ;;  %v1899_v52 = vmax.f32 %v1840_v45, 0.0  ;;  %v1844_v23 = vadd.f32 %v1843_v8, %v5679_v10  ;;  %v5255_v49 = vpop.permute.xlu1 %2516  ;;  %v5690_v41 = vld [vmem:[#allocation54_spill] sm:$0xff] }
 0x35c   : > { %v2607_v37 = vadd.f32 %v2606_v34, %v2581_v17  ;;  %v2390_v38 = vmul.f32 %v5143_v44, %v1898_v53  ;;  %v1900_v58 = vmax.f32 %v1842_v7, 0.0  ;;  %v2552_v1 = vmul.f32 %v5680_v61, %v5684_v42  ;;  %v5691_v7 = vld [vmem:[#allocation48_spill] sm:$0xff]  ;;  %v5692_v8 = vld [vmem:[#allocation38_spill] sm:$0xff]  ;;  %v5699_v42 = vld [vmem:[#allocation51_spill] sm:$0xff] }
 0x35d   : > { %v2628_v27 = vadd.f32 %v2627_v29, %v2582_v51  ;;  %v2391_v15 = vmul.f32 %v5143_v44, %v1899_v52  ;;  %v1901_v43 = vmax.f32 %v1844_v23, 0.0  ;;  %v2264_v59 = vmul.f32 %v5682_v28, %v5685_v6  ;;  %v5693_v51 = vld [vmem:[#allocation16_spill] sm:$0xff] }
 0x35e   : > { %v2422_v55 = vadd.f32 %v2390_v38, %v2261_v14  ;;  %v2392_v31 = vmul.f32 %v5683_v18, %v1900_v58  ;;  %v2553_v60 = vmul.f32 %v5687_v54, %v5686_v2  ;;  %v2554_v9 = vmul.f32 %v5687_v54, %v5689_v50  ;;  %v5266_v14 = vpop.permute.xlu0 %2236  ;;  %v5694_v38 = vld [vmem:[#allocation49_spill] sm:$0xff] }
 0x35f   : > { %v2423_v47 = vadd.f32 %v2391_v15, %v2262_v25  ;;  %v2393_v32 = vmul.f32 %v5683_v18, %v1901_v43  ;;  %v1847_v44 = vpop.f32.mrb[32].mxu1  ;;  %v2265_v29 = vmul.f32 %v5692_v8, %v5691_v7  ;;  %v2266_v58 = vmul.f32 %v5692_v8, %v5694_v38  ;;  %v5695_v15 = vld [vmem:[#allocation75_spill] sm:$0xff]  ;;  %v5273_v61 = vpop.permute.xlu1 %2365 }
 0x360   : > { %v2583_v11 = vadd.f32 %v2551_v39, %v2422_v55  ;;  %v2424_v20 = vadd.f32 %v2392_v31, %v2263_v46  ;;  %v1848_v62 = vadd.f32 %v1847_v44, %v5688_v3  ;;  %v1849_v21 = vpop.f32.mrb[33].mxu1  ;;  %v2555_v43 = vmul.f32 %v5167_v33, %v5695_v15  ;;  %v5696_v55 = vld [vmem:[#allocation50_spill] sm:$0xff]  ;;  %v5698_v18 = vld [vmem:[#allocation31_spill] sm:$0xff] }
 0x361   : > { %v2584_v13 = vadd.f32 %v2552_v1, %v2423_v47  ;;  %v2425_v56 = vadd.f32 %v2393_v32, %v2264_v59  ;;  %v1850_v16 = vadd.f32 %v1849_v21, %v5688_v3  ;;  %v1851_v22 = vpop.f32.mrb[34].mxu1  ;;  %v2267_v28 = vmul.f32 %v5697_v26, %v5696_v55  ;;  %v5700_v32 = vld [vmem:[#allocation76_spill] sm:$0xff]  ;;  %v5702_v3 = vld [vmem:[#allocation33_spill] sm:$0xff]  ;;  %v5710_v55 = vld [vmem:[#allocation39_spill] sm:$0xff] }
 0x362   : > { %v2608_v40 = vadd.f32 %v2607_v37, %v2583_v11  ;;  %v2585_v4 = vadd.f32 %v2553_v60, %v2424_v20  ;;  %v1902_v57 = vmax.f32 %v1848_v62, 0.0  ;;  %v1852_v0 = vadd.f32 %v1851_v22, %v5690_v41  ;;  %v1853_v45 = vpop.f32.mrb[35].mxu1  ;;  %v5701_v60 = vld [vmem:[#allocation27_spill] sm:$0xff] }
 0x363   : > { %v2629_v12 = vadd.f32 %v2628_v27, %v2584_v13  ;;  %v2586_v34 = vadd.f32 %v2554_v9, %v2425_v56  ;;  %v1903_v17 = vmax.f32 %v1850_v16, 0.0  ;;  %v1854_v53 = vadd.f32 %v1853_v45, %v5690_v41  ;;  %v5703_v16 = vld [vmem:[#allocation61_spill] sm:$0xff] }
 0x364   : > { %v2609_v10 = vadd.f32 %v2608_v40, %v2585_v4  ;;  %v2394_v52 = vmul.f32 %v5693_v51, %v1902_v57  ;;  %v1904_v23 = vmax.f32 %v1852_v0, 0.0  ;;  %v2556_v31 = vmul.f32 %v5167_v33, %v5698_v18  ;;  %v2522_v4 = vpop.permute.xlu0 %2521  ;;  %v5711_v18 = vld [vmem:[#allocation78_spill] sm:$0xff] }
 0x365   : > { %v2630_v37 = vadd.f32 %v2629_v12, %v2586_v34  ;;  %v2395_v25 = vmul.f32 %v5693_v51, %v1903_v17  ;;  %v1905_v27 = vmax.f32 %v1854_v53, 0.0  ;;  %v2268_v1 = vmul.f32 %v5697_v26, %v5699_v42  ;;  %v5291_v12 = vpop.permute.xlu1 %2241  ;;  %v5704_v34 = vld [vmem:[#allocation57_spill] sm:$0xff]  ;;  %v5705_v17 = vld [vmem:[#allocation7_spill] sm:$0xff] }
 0x366   : > { %v2426_v39 = vadd.f32 %v2394_v52, %v2265_v29  ;;  %v2396_v46 = vmul.f32 %v5162_v19, %v1904_v23  ;;  %v2557_v44 = vmul.f32 %v5183_v36, %v5700_v32  ;;  %v2558_v62 = vmul.f32 %v5183_v36, %v5702_v3  ;;  %v5706_v29 = vld [vmem:[#allocation58_spill] sm:$0xff] }
 0x367   : > { %v2427_v47 = vadd.f32 %v2395_v25, %v2266_v58  ;;  %v2397_v6 = vmul.f32 %v5162_v19, %v1905_v27  ;;  %v1857_v59 = vpop.f32.mrb[36].mxu1  ;;  %v2269_v53 = vmul.f32 %v5705_v17, %v5704_v34  ;;  %v2270_v51 = vmul.f32 %v5705_v17, %v5706_v29  ;;  %v5708_v58 = vld [vmem:[#allocation77_spill] sm:$0xff]  ;;  %v5717_v34 = vld [vmem:[#allocation55_spill] sm:$0xff] }
 0x368   : > { %v2587_v2 = vadd.f32 %v2555_v43, %v2426_v39  ;;  %v2428_v54 = vadd.f32 %v2396_v46, %v2267_v28  ;;  %v1858_v11 = vadd.f32 %v1857_v59, %v5701_v60  ;;  %v1859_v20 = vpop.f32.mrb[37].mxu1  ;;  %v2559_v25 = vmul.f32 %v5226_v5, %v5708_v58  ;;  %v5709_v43 = vld [vmem:[#allocation60_spill] sm:$0xff] }
 0x369   : > { %v2588_v21 = vadd.f32 %v2556_v31, %v2427_v47  ;;  %v2429_v33 = vadd.f32 %v2397_v6, %v2268_v1  ;;  %v1860_v50 = vadd.f32 %v1859_v20, %v5701_v60  ;;  %v1861_v9 = vpop.f32.mrb[38].mxu1  ;;  %v2272_v39 = vmul.f32 %v5202_v48, %v5709_v43  ;;  %v2527_v47 = vpop.permute.xlu1 %2526  ;;  %v5712_v6 = vld [vmem:[#allocation28_spill] sm:$0xff] }
 0x36a   : > { %v2610_v13 = vadd.f32 %v2609_v10, %v2587_v2  ;;  %v2589_v56 = vadd.f32 %v2557_v44, %v2428_v54  ;;  %v1906_v19 = vmax.f32 %v1858_v11, 0.0  ;;  %v1862_v22 = vadd.f32 %v1861_v9, %v5703_v16  ;;  %v1863_v40 = vpop.f32.mrb[39].mxu1  ;;  %v5713_v44 = vld [vmem:[#allocation40_spill] sm:$0xff] }
 0x36b   : > { %v2631_v57 = vadd.f32 %v2630_v37, %v2588_v21  ;;  %v2590_v41 = vadd.f32 %v2558_v62, %v2429_v33  ;;  %v1907_v0 = vmax.f32 %v1860_v50, 0.0  ;;  %v1864_v45 = vadd.f32 %v1863_v40, %v5703_v16  ;;  %v5707_v37 = vld [vmem:[#allocation59_spill] sm:$0xff]  ;;  %v5714_v62 = vld [vmem:[#allocation66_spill] sm:$0xff] }
 0x36c   : > { %v2611_v36 = vadd.f32 %v2610_v13, %v2589_v56  ;;  %v2398_v7 = vmul.f32 %v5178_v63, %v1906_v19  ;;  %v1908_v10 = vmax.f32 %v1862_v22, 0.0  ;;  %v2271_v38 = vmul.f32 %v5202_v48, %v5707_v37  ;;  %v2371_v48 = vpop.permute.xlu0 %2370  ;;  %v5715_v19 = vld [vmem:[#allocation52_spill] sm:$0xff] }
 0x36d   : > { %v2632_v8 = vadd.f32 %v2631_v57, %v2590_v41  ;;  %v2399_v52 = vmul.f32 %v5178_v63, %v1907_v0  ;;  %v1909_v23 = vmax.f32 %v1864_v45, 0.0  ;;  %v2560_v26 = vmul.f32 %v5226_v5, %v5710_v55  ;;  %v5716_v57 = vld [vmem:[#allocation53_spill] sm:$0xff] }
 0x36e   : > { %v2430_v27 = vadd.f32 %v2398_v7, %v2269_v53  ;;  %v2400_v15 = vmul.f32 %v5207_v30, %v1908_v10  ;;  %v2561_v31 = vmul.f32 %v5255_v49, %v5711_v18  ;;  %v2562_v2 = vmul.f32 %v5255_v49, %v5713_v44  ;;  %v5718_v53 = vld [vmem:[#allocation79_spill] sm:$0xff]  ;;  %v2376_v10 = vpop.permute.xlu1 %2375 }
 0x36f   : > { %v2431_v28 = vadd.f32 %v2399_v52, %v2270_v51  ;;  %v2401_v46 = vmul.f32 %v5207_v30, %v1909_v23  ;;  %v1867_v63 = vpop.f32.mrb[40].mxu1  ;;  %v2273_v49 = vmul.f32 %v5231_v35, %v5715_v19  ;;  %v2274_v41 = vmul.f32 %v5231_v35, %v5716_v57  ;;  %v5719_v51 = vld [vmem:[#allocation56_spill] sm:$0xff]  ;;  %v5728_v19 = vld [vmem:[#allocation70_spill] sm:$0xff] }
 0x370   : > { %v2591_v42 = vadd.f32 %v2559_v25, %v2430_v27  ;;  %v2432_v1 = vadd.f32 %v2400_v15, %v2271_v38  ;;  %v1868_v59 = vadd.f32 %v1867_v63, %v5712_v6  ;;  %v1869_v32 = vpop.f32.mrb[41].mxu1  ;;  %v2275_v17 = vmul.f32 %v5266_v14, %v5717_v34  ;;  %v5720_v23 = vld [vmem:[#allocation72_spill] sm:$0xff]  ;;  %v2247_v38 = vpop.permute.xlu0 %2246  ;;  %v5731_v34 = vld [vmem:[#allocation69_spill] sm:$0xff] }
 0x371   : > { %v2592_v54 = vadd.f32 %v2560_v26, %v2431_v28  ;;  %v2433_v60 = vadd.f32 %v2401_v46, %v2272_v39  ;;  %v1870_v5 = vadd.f32 %v1869_v32, %v5712_v6  ;;  %v1871_v11 = vpop.f32.mrb[42].mxu1  ;;  %v2563_v7 = vmul.f32 %v2522_v4, %v5718_v53  ;;  %v5721_v25 = vld [vmem:[#allocation68_spill] sm:$0xff]  ;;  %v5722_v39 = vld [vmem:[#allocation30_spill] sm:$0xff]  ;;  %v5723_v28 = vld [vmem:[#allocation73_spill] sm:$0xff] }
 0x372   : > { %v2612_v30 = vadd.f32 %v2611_v36, %v2591_v42  ;;  %v2593_v20 = vadd.f32 %v2561_v31, %v2432_v1  ;;  %v1910_v3 = vmax.f32 %v1868_v59, 0.0  ;;  %v1872_v21 = vadd.f32 %v1871_v11, %v5714_v62  ;;  %v1873_v33 = vpop.f32.mrb[43].mxu1  ;;  %v5724_v6 = vld [vmem:[#allocation67_spill] sm:$0xff] }
 0x373   : > { %v2633_v50 = vadd.f32 %v2632_v8, %v2592_v54  ;;  %v2594_v9 = vadd.f32 %v2562_v2, %v2433_v60  ;;  %v1911_v13 = vmax.f32 %v1870_v5, 0.0  ;;  %v1874_v56 = vadd.f32 %v1873_v33, %v5714_v62  ;;  %v5725_v5 = vld [vmem:[#allocation62_spill] sm:$0xff] }
 0x374   : > { %v2613_v16 = vadd.f32 %v2612_v30, %v2593_v20  ;;  %v2402_v22 = vmul.f32 %v5246_v24, %v1910_v3  ;;  %v1912_v40 = vmax.f32 %v1872_v21, 0.0  ;;  %v2276_v52 = vmul.f32 %v5266_v14, %v5719_v51  ;;  %v2532_v32 = vpop.permute.xlu0 %2531  ;;  %v5726_v3 = vld [vmem:[#allocation63_spill] sm:$0xff]  ;;  %v2537_v21 = vpop.permute.xlu1 %2536 }
 0x375   : > { %v2634_v0 = vadd.f32 %v2633_v50, %v2594_v9  ;;  %v2403_v45 = vmul.f32 %v5246_v24, %v1911_v13  ;;  %v1913_v36 = vmax.f32 %v1874_v56, 0.0  ;;  %v2564_v37 = vmul.f32 %v2522_v4, %v5720_v23  ;;  %v5727_v13 = vld [vmem:[#allocation64_spill] sm:$0xff] }
 0x376   : > { %v2434_v8 = vadd.f32 %v2402_v22, %v2273_v49  ;;  %v2404_v29 = vmul.f32 %v5273_v61, %v1912_v40  ;;  %v2565_v27 = vmul.f32 %v2527_v47, %v5721_v25  ;;  %v2566_v46 = vmul.f32 %v2527_v47, %v5723_v28  ;;  %v5729_v40 = vld [vmem:[#allocation65_spill] sm:$0xff] }
 0x377   : > { %v2435_v35 = vadd.f32 %v2403_v45, %v2274_v41  ;;  %v2405_v58 = vmul.f32 %v5273_v61, %v1913_v36  ;;  %v1877_v24 = vpop.f32.mrb[44].mxu1  ;;  %v2277_v47 = vmul.f32 %v5291_v12, %v5725_v5  ;;  %v2278_v62 = vmul.f32 %v5291_v12, %v5726_v3  ;;  %v5730_v41 = vld [vmem:[#allocation35_spill] sm:$0xff] }
 0x378   : > { %v2595_v15 = vadd.f32 %v2563_v7, %v2434_v8  ;;  %v2436_v43 = vadd.f32 %v2404_v29, %v2275_v17  ;;  %v1878_v55 = vadd.f32 %v1877_v24, %v5722_v39  ;;  %v1879_v26 = vpop.f32.mrb[45].mxu1  ;;  %v2279_v56 = vmul.f32 %v2247_v38, %v5727_v13  ;;  %v5732_v7 = vld [vmem:[#allocation80_spill] sm:$0xff] }
 0x379   : > { %v2596_v63 = vadd.f32 %v2564_v37, %v2435_v35  ;;  %v2437_v18 = vadd.f32 %v2405_v58, %v2276_v52  ;;  %v1880_v14 = vadd.f32 %v1879_v26, %v5722_v39  ;;  %v1881_v31 = vpop.f32.mrb[46].mxu1  ;;  %v2567_v49 = vmul.f32 %v2532_v32, %v5728_v19 }
 0x37a   : > { %v2614_v4 = vadd.f32 %v2613_v16, %v2595_v15  ;;  %v2597_v42 = vadd.f32 %v2565_v27, %v2436_v43  ;;  %v1914_v1 = vmax.f32 %v1878_v55, 0.0  ;;  %v1882_v61 = vadd.f32 %v1881_v31, %v5724_v6  ;;  %v1883_v59 = vpop.f32.mrb[47].mxu1 }
 0x37b   : > { %v2635_v44 = vadd.f32 %v2634_v0, %v2596_v63  ;;  %v2598_v2 = vadd.f32 %v2566_v46, %v2437_v18  ;;  %v1915_v54 = vmax.f32 %v1880_v14, 0.0  ;;  %v1884_v60 = vadd.f32 %v1883_v59, %v5724_v6 }
 0x37c   : > { %v2615_v11 = vadd.f32 %v2614_v4, %v2597_v42  ;;  %v2406_v30 = vmul.f32 %v2371_v48, %v1914_v1  ;;  %v1916_v20 = vmax.f32 %v1882_v61, 0.0  ;;  %v2280_v57 = vmul.f32 %v2247_v38, %v5729_v40 }
 0x37d   : > { %v2636_v33 = vadd.f32 %v2635_v44, %v2598_v2  ;;  %v2407_v50 = vmul.f32 %v2371_v48, %v1915_v54  ;;  %v1917_v9 = vmax.f32 %v1884_v60, 0.0  ;;  %v2568_v0 = vmul.f32 %v2532_v32, %v5730_v41  ;;  %v5733_v54 = vld [vmem:[#allocation6_spill] sm:$0xff] }
 0x37e   : > { %v2438_v16 = vadd.f32 %v2406_v30, %v2277_v47  ;;  %v2408_v22 = vmul.f32 %v2376_v10, %v1916_v20  ;;  %v2569_v17 = vmul.f32 %v2537_v21, %v5731_v34  ;;  %v2570_v8 = vmul.f32 %v2537_v21, %v5732_v7 }
 0x37f   : > { %v2439_v45 = vadd.f32 %v2407_v50, %v2278_v62  ;;  %v2409_v36 = vmul.f32 %v2376_v10, %v1917_v9  ;;  %v2646_v26 = vstv %s2645_s24  ;;  %v3263_v59 = vmov 1966171168  }
 0x380   : > { %v2599_v53 = vadd.f32 %v2567_v49, %v2438_v16  ;;  %v2440_v12 = vadd.f32 %v2408_v22, %v2279_v56  ;;  %v2665_v32 = vunpack.c.l.s4 %v3263_v59  ;;  %v5734_v30 = vlaneseq }
 0x381   : > { %v2600_v48 = vadd.f32 %v2568_v0, %v2439_v45  ;;  %v2441_v29 = vadd.f32 %v2409_v36, %v2280_v57 }
 0x382   : > { %v2616_v51 = vadd.f32 %v2615_v11, %v2599_v53  ;;  %v2601_v52 = vadd.f32 %v2569_v17, %v2440_v12  ;;  %v2666_v44 = vunpack.c.0.s8 %v2665_v32  ;;  %vm2681_vm0 = vcmp.lt.s32.totalorder %v5734_v30, 256 }
 0x383   : > { %v2637_v23 = vadd.f32 %v2636_v33, %v2600_v48  ;;  %v2602_v37 = vadd.f32 %v2570_v8, %v2441_v29 }
 0x384   : > { %v2617_v35 = vadd.f32 %v2616_v51, %v2601_v52  ;;  %v2669_v60 = vsub.s32 %v2666_v44, %v5733_v54 }
 0x385   : > { %v2638_v58 = vadd.f32 %v2637_v23, %v2602_v37 }
 0x386   : > { %v2618_v24 = vrot.slane %v2617_v35, 4 }
 0x387   : > { %v2639_v38 = vrot.slane %v2638_v58, 4 }
 0x388   : > { %v2619_v25 = vadd.f32 %v2618_v24, %v2617_v35 }
 0x389   : > { %v2640_v27 = vadd.f32 %v2639_v38, %v2638_v58 }
 0x38a   : > { %v2620_v10 = vrot.slane %v2619_v25, 2 }
 0x38b   : > { %v2641_v15 = vrot.slane %v2640_v27, 2 }
 0x38c   : > { %v2621_v43 = vadd.f32 %v2620_v10, %v2619_v25 }
 0x38d   : > { %v2642_v39 = vadd.f32 %v2641_v15, %v2640_v27 }
 0x38e   : > { %v2622_v55 = vrot.slane %v2621_v43, 1 }
 0x38f   : > { %v2643_v28 = vrot.slane %v2642_v39, 1 }
 0x390   : > { %v2623_v46 = vadd.f32 %v2622_v55, %v2621_v43 }
 0x391   : > { %v2644_v63 = vadd.f32 %v2643_v28, %v2642_v39 }
 0x392   : > { %v2647_v18 = vadd.f32 %v2646_v26, %v2623_v46 }
 0x393   : > { %v2648_v14 = vadd.f32 %v2646_v26, %v2644_v63 }
 0x394   : > { %v3119_v31 = vmul.f32 -1.442695, %v2647_v18 }
 0x395   : > { %v3120_v4 = vmul.f32 -1.442695, %v2648_v14 }
 0x396   : > { %3189 = vpow2.f32 %v3119_v31 }
 0x397   : > { %3191 = vpow2.f32 %v3120_v4 }
 0x3a0   : > { %v3190_v42 = vpop.eup %3189 }
 0x3a1   : > { %v3192_v1 = vpop.eup %3191  ;;  %v2655_v6 = vadd.f32 1.0, %v3190_v42 }
 0x3a2   : > { %v2656_v61 = vadd.f32 1.0, %v3192_v1 }
 0x3a3   : > { %3193 = vrcp.f32 %v2655_v6 }
 0x3a4   : > { %3195 = vrcp.f32 %v2656_v61 }
 0x3ad   : > { %v3194_v2 = vpop.eup %3193 }
 0x3ae   : > { %v3196_v5 = vpop.eup %3195 }
 0x3af   : > { %v2663_v47 = vcombine.low %v3194_v2, %v3196_v5 }
 0x3b1   : > { %v2670_v11 = vrot.slane %v2663_v47, %v2669_v60 }
 0x3b3   : > { %v2677_v20 = vrot.slane %v2670_v11, %v2669_v60 }
 0x3b5   : > { %2683 = vst.msk [vmem:[%s273_s10] sm:$0x3] %vm2681_vm0, %v2677_v20 }
 0x3b6   : > { %3210 = shalt.err (!%p3207_p3)
}
 0x3b7   : > { %s3211_s22 = scalar_lea.hbm %s5354_s17, 32  ;;  %s3215_s25 = scalar_lea.hbm %s5403_s7, 64 }
 0x3b8   : > { %p3212_p4 = scmp.ne.s32.totalorder %s5354_s17, %s3211_s22  ;;  %p3216_p9 = scmp.lt.u32.totalorder %s5354_s17, %s5403_s7 }
 0x3b9   : > { %p3217_p10 = scmp.lt.u32.totalorder %s3215_s25, %s3211_s22  ;;  %p3219_p12 = scmp.lt.u32.totalorder %s3211_s22, %s5354_s17 }
 0x3ba   : > { %p3213_p7 = pnand %p3212_p4, %p3346_p5 }
 0x3bb   : > { %p3218_p11 = por %p3217_p10, %p3216_p9 }
 0x3bc   : > { %p3214_p8 = pneg %p3213_p7 }
 0x3bd   : > { %p3220_p13 = por %p3219_p12, %p3218_p11 }
 0x3bf   : > { %p3221_p0 = pnand %p3220_p13, %p3214_p8 }
 0x3c1   : > { %3224 = shalt.err (!%p3221_p0)
}
 0x3c2   : > { %3127 = dma.vmem_to_hbm [thread:$0]  (%p3346_p5), %s5356_s14, 32, %s5354_s17, %s2685_s18  }
 0x3c3 PF: > { %p3133_p1 = scmp.ge.s32.totalorder %s3259_s29, 2  ;;  %s2711_s10 = sand.u32 1, %s3247_s26  }
 0x3c4   : > { %s2712_s15 = scalar_lea.sflag [#allocation4], %s2711_s10 }
 0x3c5   : > { %p3130_p2 = pnand %p3133_p1, %p3350_p6 }
 0x3c7   : > { %3242 = dma.done.wait (!%p3130_p2), %s2712_s15, 32  }
 0x3c8   : > { %3244 = vsyncadd (!%p3130_p2), %s2712_s15, 4294967264  ;;  %p18_p3 = scmp.ge.s32.totalorder %s3333_s8, 4   ;;  %s5735_s26 = smov %s3251_s27 }
 0x3c9   : > { %s5736_s27 = smov %s3255_s28  ;;  %s5737_s28 = smov %s3344_s11 }
 0x3ca   : > { %s5738_s29 = smov %s3333_s8  ;;  %20 = sbr.rel (!%p18_p3) target bundleno = 5 (0x5), region = 88 }
 0x3d1   :  { %2717 = vsyncpa [#allocation4], 1 }
 0x3d2   :  { %2719 = vsyncpa [#allocation4 + $0x1], 1 }

</bundles_post_ra>
